<compile_context>
chip_gen: v7x
topology: tpu7x:2x2x1
jax: 0.10.0
libtpu: 0.0.40
codegen_flags: <defaults>
</compile_context>

<pallas_src>
import numpy as np

import jax
import jax.numpy as jnp
from jax import lax
from jax.experimental import pallas as pl
from jax.experimental.pallas import tpu as pltpu


# ----------------------------------------------------------------------------
# Fused multi-layer LSTM kernel (single invocation, everything in VMEM).
# Gate ordering inside the kernel is [i, f, o, g] (reordered at packing time).
# ----------------------------------------------------------------------------
def _make_encoder_kernel(n_layers, T, B, H):
    def kernel(*refs):
        x_ref = refs[0]                               # (T*B, D) time-major, flattened
        layer_refs = refs[1:1 + 3 * n_layers]         # (wih_t, whh_t, bias) per layer
        h_out_ref = refs[1 + 3 * n_layers]            # (n_layers, B, H)
        c_out_ref = refs[2 + 3 * n_layers]            # (n_layers, B, H)
        gates_scr = refs[3 + 3 * n_layers]            # (T*B, 4H) VMEM scratch
        seq_scr = refs[4 + 3 * n_layers]              # (T*B, H)  VMEM scratch

        for layer in range(n_layers):
            wih_ref = layer_refs[3 * layer + 0]       # (D_in, 4H)
            whh_ref = layer_refs[3 * layer + 1]       # (H, 4H)
            b_ref = layer_refs[3 * layer + 2]         # (1, 4H)

            # ---- hoisted input projection: one GEMM over all timesteps ----
            src = x_ref[...] if layer == 0 else seq_scr[...]
            gates_scr[...] = (
                jnp.dot(src, wih_ref[...], preferred_element_type=jnp.float32)
                + b_ref[...])

            # ---- recurrence (fully unrolled; only the h @ W_hh GEMM per step) ----
            whh = whh_ref[...]
            h = jnp.zeros((B, H), jnp.float32)
            c = jnp.zeros((B, H), jnp.float32)
            last = layer == n_layers - 1
            for t in range(T):
                rows = slice(t * B, (t + 1) * B)
                gates = gates_scr[rows, :] + jnp.dot(
                    h, whh, preferred_element_type=jnp.float32)      # (B, 4H)
                ifo = jax.nn.sigmoid(gates[:, :3 * H])               # one sigmoid push
                g = jnp.tanh(gates[:, 3 * H:])                       # one tanh push
                c = ifo[:, H:2 * H] * c + ifo[:, :H] * g
                h = ifo[:, 2 * H:3 * H] * jnp.tanh(c)
                if not last:                                         # last layer's seq is dead
                    seq_scr[rows, :] = h

            h_out_ref[layer] = h
            c_out_ref[layer] = c

    return kernel


# ----------------------------------------------------------------------------
# Wrapper: batch_first (B, T, D) in, (hidden, cell) each (n_layers, B, H) out,
# matching nn.LSTM's return convention.
# ----------------------------------------------------------------------------
@jax.jit
def lstm_encoder_forward(x_context, packed_params):
    B, T, D = x_context.shape
    n_layers = len(packed_params)
    H = packed_params[0][1].shape[0]                  # whh_t: (H, 4H)

    # time-major, then flatten (T, B) -> T*B rows for the hoisted projection GEMM
    x_flat = jnp.transpose(x_context, (1, 0, 2)).reshape(T * B, D).astype(jnp.float32)

    flat_inputs = [x_flat]
    for wih_t, whh_t, bias in packed_params:
        flat_inputs.extend([wih_t, whh_t, bias])

    kernel = _make_encoder_kernel(n_layers=n_layers, T=T, B=B, H=H)

    h_out, c_out = pl.pallas_call(
        kernel,
        out_shape=(
            jax.ShapeDtypeStruct((n_layers, B, H), jnp.float32),
            jax.ShapeDtypeStruct((n_layers, B, H), jnp.float32),
        ),
        in_specs=[pl.BlockSpec(memory_space=pltpu.MemorySpace.VMEM)] * len(flat_inputs),
        out_specs=(
            pl.BlockSpec(memory_space=pltpu.MemorySpace.VMEM),
            pl.BlockSpec(memory_space=pltpu.MemorySpace.VMEM),
        ),
        scratch_shapes=[
            pltpu.VMEM((T * B, 4 * H), jnp.float32),  # precomputed input projections
            pltpu.VMEM((T * B, H), jnp.float32),      # inter-layer sequence (never hits HBM)
        ],
    )(*flat_inputs)
    return h_out, c_out


# ----------------------------------------------------------------------------
# Parameter init (PyTorch layout / gate order [i, f, g, o]) + kernel packing
# (transpose, merge biases, reorder gates to [i, f, o, g]).
# ----------------------------------------------------------------------------
def init_lstm_params(key, input_dim, hidden_dim, n_layers):
    bound = 1.0 / np.sqrt(hidden_dim)
    raw = []
    for layer in range(n_layers):
        d_in = input_dim if layer == 0 else hidden_dim
        key, k1, k2, k3, k4 = jax.random.split(key, 5)
        w_ih = jax.random.uniform(k1, (4 * hidden_dim, d_in), jnp.float32, -bound, bound)
        w_hh = jax.random.uniform(k2, (4 * hidden_dim, hidden_dim), jnp.float32, -bound, bound)
        b_ih = jax.random.uniform(k3, (4 * hidden_dim,), jnp.float32, -bound, bound)
        b_hh = jax.random.uniform(k4, (4 * hidden_dim,), jnp.float32, -bound, bound)
        raw.append((w_ih, w_hh, b_ih, b_hh))
    return raw


def _reorder_ifgo_to_ifog(w):
    i, f, g, o = jnp.split(w, 4, axis=0)
    return jnp.concatenate([i, f, o, g], axis=0)


def pack_params(raw_params, hidden_dim):
    packed = []
    for w_ih, w_hh, b_ih, b_hh in raw_params:
        wih_t = _reorder_ifgo_to_ifog(w_ih).T                       # (D_in, 4H)
        whh_t = _reorder_ifgo_to_ifog(w_hh).T                       # (H, 4H)
        bias = _reorder_ifgo_to_ifog(b_ih + b_hh).reshape(1, -1)    # (1, 4H)
        packed.append((wih_t, whh_t, bias))
    return packed


# ----------------------------------------------------------------------------
# Pure-JAX reference (lax.scan, canonical PyTorch gate order) for verification.
# ----------------------------------------------------------------------------
def lstm_encoder_reference(x_context, raw_params):
    x_tm = jnp.transpose(x_context, (1, 0, 2)).astype(jnp.float32)
    hiddens, cells = [], []
    for w_ih, w_hh, b_ih, b_hh in raw_params:
        H = w_hh.shape[1]
        B = x_tm.shape[1]

        def step(carry, x_t, w_ih=w_ih, w_hh=w_hh, b_ih=b_ih, b_hh=b_hh, H=H):
            h, c = carry
            gates = x_t @ w_ih.T + h @ w_hh.T + b_ih + b_hh
            i_g = jax.nn.sigmoid(gates[:, 0 * H:1 * H])
            f_g = jax.nn.sigmoid(gates[:, 1 * H:2 * H])
            g_g = jnp.tanh(gates[:, 2 * H:3 * H])
            o_g = jax.nn.sigmoid(gates[:, 3 * H:4 * H])
            c_new = f_g * c + i_g * g_g
            h_new = o_g * jnp.tanh(c_new)
            return (h_new, c_new), h_new

        init = (jnp.zeros((B, H), jnp.float32), jnp.zeros((B, H), jnp.float32))
        (h_T, c_T), seq = lax.scan(step, init, x_tm)
        x_tm = seq
        hiddens.append(h_T)
        cells.append(c_T)
    return jnp.stack(hiddens, axis=0), jnp.stack(cells, axis=0)


if __name__ == "__main__":
    # Small shapes consistent with the module's forward.
    batch, seq_len, input_dim, hidden_dim, n_layers = 2, 8, 4, 32, 2

    key = jax.random.PRNGKey(0)
    key_x, key_p = jax.random.split(key)
    x_context = jax.random.normal(key_x, (batch, seq_len, input_dim), jnp.float32)

    raw_params = init_lstm_params(key_p, input_dim, hidden_dim, n_layers)
    packed_params = pack_params(raw_params, hidden_dim)

    hidden, cell = lstm_encoder_forward(x_context, packed_params)
    jax.block_until_ready((hidden, cell))

    # Verify against the pure-JAX reference (canonical PyTorch gate order).
    h_ref, c_ref = lstm_encoder_reference(x_context, raw_params)
    np.testing.assert_allclose(np.asarray(hidden), np.asarray(h_ref), rtol=1e-5, atol=1e-5)
    np.testing.assert_allclose(np.asarray(cell), np.asarray(c_ref), rtol=1e-5, atol=1e-5)
    assert hidden.shape == (n_layers, batch, hidden_dim)
    assert cell.shape == (n_layers, batch, hidden_dim)

    print("KERNEL_OK")
</pallas_src>

<mosaic_0001>
module attributes {stable_mosaic.version = 11 : i64} {
  func.func @kernel(%arg0: memref<16x4xf32, #tpu.memory_space<vmem>>, %arg1: memref<4x128xf32, #tpu.memory_space<vmem>>, %arg2: memref<32x128xf32, #tpu.memory_space<vmem>>, %arg3: memref<1x128xf32, #tpu.memory_space<vmem>>, %arg4: memref<32x128xf32, #tpu.memory_space<vmem>>, %arg5: memref<32x128xf32, #tpu.memory_space<vmem>>, %arg6: memref<1x128xf32, #tpu.memory_space<vmem>>, %arg7: memref<2x2x32xf32, #tpu.memory_space<vmem>>, %arg8: memref<2x2x32xf32, #tpu.memory_space<vmem>>, %arg9: memref<16x128xf32, #tpu.memory_space<vmem>>, %arg10: memref<16x32xf32, #tpu.memory_space<vmem>>) attributes {dimension_semantics = [], scalar_prefetch = 0 : i64, scratch_operands = 2 : i64, tpu.core_type = #tpu.core_type<tc>} {
    %c0 = arith.constant 0 : index
    %c0_0 = arith.constant 0 : index
    %0 = vector.load %arg0[%c0, %c0_0] : memref<16x4xf32, #tpu.memory_space<vmem>>, vector<16x4xf32>
    %c0_1 = arith.constant 0 : index
    %c0_2 = arith.constant 0 : index
    %1 = vector.load %arg1[%c0_1, %c0_2] : memref<4x128xf32, #tpu.memory_space<vmem>>, vector<4x128xf32>
    %cst = arith.constant dense<0.000000e+00> : vector<16x128xf32>
    %2 = tpu.matmul %0, %1, %cst {dimension_numbers = #tpu.dot_dimension_numbers<[1], [0], [0], [1], [0, 0, 1, 1], [], []>} : vector<16x4xf32>, vector<4x128xf32>, vector<16x128xf32> -> vector<16x128xf32>
    %c0_3 = arith.constant 0 : index
    %c0_4 = arith.constant 0 : index
    %3 = vector.load %arg3[%c0_3, %c0_4] : memref<1x128xf32, #tpu.memory_space<vmem>>, vector<1x128xf32>
    %4 = vector.broadcast %3 : vector<1x128xf32> to vector<16x128xf32>
    %5 = arith.addf %2, %4 : vector<16x128xf32>
    %c0_5 = arith.constant 0 : index
    %c0_6 = arith.constant 0 : index
    %6 = vector.load %arg9[%c0_5, %c0_6] : memref<16x128xf32, #tpu.memory_space<vmem>>, vector<16x128xf32>
    tpu.vector_store %arg9[%c0_5, %c0_6], %5 {strides = array<i32>} : memref<16x128xf32, #tpu.memory_space<vmem>>, vector<16x128xf32>,
    %c0_7 = arith.constant 0 : index
    %c0_8 = arith.constant 0 : index
    %7 = vector.load %arg2[%c0_7, %c0_8] : memref<32x128xf32, #tpu.memory_space<vmem>>, vector<32x128xf32>
    %cst_9 = arith.constant 0.000000e+00 : f32
    %8 = vector.broadcast %cst_9 : f32 to vector<2x32xf32>
    %cst_10 = arith.constant 0.000000e+00 : f32
    %9 = vector.broadcast %cst_10 : f32 to vector<2x32xf32>
    %c0_11 = arith.constant 0 : index
    %c0_12 = arith.constant 0 : index
    %10 = vector.load %arg9[%c0_11, %c0_12] : memref<16x128xf32, #tpu.memory_space<vmem>>, vector<2x128xf32>
    %cst_13 = arith.constant dense<0.000000e+00> : vector<2x128xf32>
    %11 = tpu.matmul %8, %7, %cst_13 {dimension_numbers = #tpu.dot_dimension_numbers<[1], [0], [0], [1], [0, 0, 1, 1], [], []>} : vector<2x32xf32>, vector<32x128xf32>, vector<2x128xf32> -> vector<2x128xf32>
    %12 = arith.addf %10, %11 : vector<2x128xf32>
    %13 = vector.extract_strided_slice %12 {offsets = [0, 0], sizes = [2, 96], strides = [1, 1]} : vector<2x128xf32> to vector<2x96xf32>
    %14 = arith.negf %13 : vector<2x96xf32>
    %15 = math.exp %14 : vector<2x96xf32>
    %cst_14 = arith.constant 1.000000e+00 : f32
    %16 = vector.broadcast %cst_14 : f32 to vector<2x96xf32>
    %17 = arith.addf %16, %15 : vector<2x96xf32>
    %18 = arith.divf %16, %17 : vector<2x96xf32>
    %19 = vector.extract_strided_slice %12 {offsets = [0, 96], sizes = [2, 32], strides = [1, 1]} : vector<2x128xf32> to vector<2x32xf32>
    %20 = math.tanh %19 : vector<2x32xf32>
    %21 = vector.extract_strided_slice %18 {offsets = [0, 32], sizes = [2, 32], strides = [1, 1]} : vector<2x96xf32> to vector<2x32xf32>
    %22 = arith.mulf %21, %9 : vector<2x32xf32>
    %23 = vector.extract_strided_slice %18 {offsets = [0, 0], sizes = [2, 32], strides = [1, 1]} : vector<2x96xf32> to vector<2x32xf32>
    %24 = arith.mulf %23, %20 : vector<2x32xf32>
    %25 = arith.addf %22, %24 : vector<2x32xf32>
    %26 = vector.extract_strided_slice %18 {offsets = [0, 64], sizes = [2, 32], strides = [1, 1]} : vector<2x96xf32> to vector<2x32xf32>
    %27 = math.tanh %25 : vector<2x32xf32>
    %28 = arith.mulf %26, %27 : vector<2x32xf32>
    %c0_15 = arith.constant 0 : index
    %c0_16 = arith.constant 0 : index
    %29 = vector.load %arg10[%c0_15, %c0_16] : memref<16x32xf32, #tpu.memory_space<vmem>>, vector<2x32xf32>
    tpu.vector_store %arg10[%c0_15, %c0_16], %28 {strides = array<i32>} : memref<16x32xf32, #tpu.memory_space<vmem>>, vector<2x32xf32>,
    %c2 = arith.constant 2 : index
    %c0_17 = arith.constant 0 : index
    %30 = vector.load %arg9[%c2, %c0_17] : memref<16x128xf32, #tpu.memory_space<vmem>>, vector<2x128xf32>
    %cst_18 = arith.constant dense<0.000000e+00> : vector<2x128xf32>
    %31 = tpu.matmul %28, %7, %cst_18 {dimension_numbers = #tpu.dot_dimension_numbers<[1], [0], [0], [1], [0, 0, 1, 1], [], []>} : vector<2x32xf32>, vector<32x128xf32>, vector<2x128xf32> -> vector<2x128xf32>
    %32 = arith.addf %30, %31 : vector<2x128xf32>
    %33 = vector.extract_strided_slice %32 {offsets = [0, 0], sizes = [2, 96], strides = [1, 1]} : vector<2x128xf32> to vector<2x96xf32>
    %34 = arith.negf %33 : vector<2x96xf32>
    %35 = math.exp %34 : vector<2x96xf32>
    %cst_19 = arith.constant 1.000000e+00 : f32
    %36 = vector.broadcast %cst_19 : f32 to vector<2x96xf32>
    %37 = arith.addf %36, %35 : vector<2x96xf32>
    %38 = arith.divf %36, %37 : vector<2x96xf32>
    %39 = vector.extract_strided_slice %32 {offsets = [0, 96], sizes = [2, 32], strides = [1, 1]} : vector<2x128xf32> to vector<2x32xf32>
    %40 = math.tanh %39 : vector<2x32xf32>
    %41 = vector.extract_strided_slice %38 {offsets = [0, 32], sizes = [2, 32], strides = [1, 1]} : vector<2x96xf32> to vector<2x32xf32>
    %42 = arith.mulf %41, %25 : vector<2x32xf32>
    %43 = vector.extract_strided_slice %38 {offsets = [0, 0], sizes = [2, 32], strides = [1, 1]} : vector<2x96xf32> to vector<2x32xf32>
    %44 = arith.mulf %43, %40 : vector<2x32xf32>
    %45 = arith.addf %42, %44 : vector<2x32xf32>
    %46 = vector.extract_strided_slice %38 {offsets = [0, 64], sizes = [2, 32], strides = [1, 1]} : vector<2x96xf32> to vector<2x32xf32>
    %47 = math.tanh %45 : vector<2x32xf32>
    %48 = arith.mulf %46, %47 : vector<2x32xf32>
    %c2_20 = arith.constant 2 : index
    %c0_21 = arith.constant 0 : index
    %49 = vector.load %arg10[%c2_20, %c0_21] : memref<16x32xf32, #tpu.memory_space<vmem>>, vector<2x32xf32>
    tpu.vector_store %arg10[%c2_20, %c0_21], %48 {strides = array<i32>} : memref<16x32xf32, #tpu.memory_space<vmem>>, vector<2x32xf32>,
    %c4 = arith.constant 4 : index
    %c0_22 = arith.constant 0 : index
    %50 = vector.load %arg9[%c4, %c0_22] : memref<16x128xf32, #tpu.memory_space<vmem>>, vector<2x128xf32>
    %cst_23 = arith.constant dense<0.000000e+00> : vector<2x128xf32>
    %51 = tpu.matmul %48, %7, %cst_23 {dimension_numbers = #tpu.dot_dimension_numbers<[1], [0], [0], [1], [0, 0, 1, 1], [], []>} : vector<2x32xf32>, vector<32x128xf32>, vector<2x128xf32> -> vector<2x128xf32>
    %52 = arith.addf %50, %51 : vector<2x128xf32>
    %53 = vector.extract_strided_slice %52 {offsets = [0, 0], sizes = [2, 96], strides = [1, 1]} : vector<2x128xf32> to vector<2x96xf32>
    %54 = arith.negf %53 : vector<2x96xf32>
    %55 = math.exp %54 : vector<2x96xf32>
    %cst_24 = arith.constant 1.000000e+00 : f32
    %56 = vector.broadcast %cst_24 : f32 to vector<2x96xf32>
    %57 = arith.addf %56, %55 : vector<2x96xf32>
    %58 = arith.divf %56, %57 : vector<2x96xf32>
    %59 = vector.extract_strided_slice %52 {offsets = [0, 96], sizes = [2, 32], strides = [1, 1]} : vector<2x128xf32> to vector<2x32xf32>
    %60 = math.tanh %59 : vector<2x32xf32>
    %61 = vector.extract_strided_slice %58 {offsets = [0, 32], sizes = [2, 32], strides = [1, 1]} : vector<2x96xf32> to vector<2x32xf32>
    %62 = arith.mulf %61, %45 : vector<2x32xf32>
    %63 = vector.extract_strided_slice %58 {offsets = [0, 0], sizes = [2, 32], strides = [1, 1]} : vector<2x96xf32> to vector<2x32xf32>
    %64 = arith.mulf %63, %60 : vector<2x32xf32>
    %65 = arith.addf %62, %64 : vector<2x32xf32>
    %66 = vector.extract_strided_slice %58 {offsets = [0, 64], sizes = [2, 32], strides = [1, 1]} : vector<2x96xf32> to vector<2x32xf32>
    %67 = math.tanh %65 : vector<2x32xf32>
    %68 = arith.mulf %66, %67 : vector<2x32xf32>
    %c4_25 = arith.constant 4 : index
    %c0_26 = arith.constant 0 : index
    %69 = vector.load %arg10[%c4_25, %c0_26] : memref<16x32xf32, #tpu.memory_space<vmem>>, vector<2x32xf32>
    tpu.vector_store %arg10[%c4_25, %c0_26], %68 {strides = array<i32>} : memref<16x32xf32, #tpu.memory_space<vmem>>, vector<2x32xf32>,
    %c6 = arith.constant 6 : index
    %c0_27 = arith.constant 0 : index
    %70 = vector.load %arg9[%c6, %c0_27] : memref<16x128xf32, #tpu.memory_space<vmem>>, vector<2x128xf32>
    %cst_28 = arith.constant dense<0.000000e+00> : vector<2x128xf32>
    %71 = tpu.matmul %68, %7, %cst_28 {dimension_numbers = #tpu.dot_dimension_numbers<[1], [0], [0], [1], [0, 0, 1, 1], [], []>} : vector<2x32xf32>, vector<32x128xf32>, vector<2x128xf32> -> vector<2x128xf32>
    %72 = arith.addf %70, %71 : vector<2x128xf32>
    %73 = vector.extract_strided_slice %72 {offsets = [0, 0], sizes = [2, 96], strides = [1, 1]} : vector<2x128xf32> to vector<2x96xf32>
    %74 = arith.negf %73 : vector<2x96xf32>
    %75 = math.exp %74 : vector<2x96xf32>
    %cst_29 = arith.constant 1.000000e+00 : f32
    %76 = vector.broadcast %cst_29 : f32 to vector<2x96xf32>
    %77 = arith.addf %76, %75 : vector<2x96xf32>
    %78 = arith.divf %76, %77 : vector<2x96xf32>
    %79 = vector.extract_strided_slice %72 {offsets = [0, 96], sizes = [2, 32], strides = [1, 1]} : vector<2x128xf32> to vector<2x32xf32>
    %80 = math.tanh %79 : vector<2x32xf32>
    %81 = vector.extract_strided_slice %78 {offsets = [0, 32], sizes = [2, 32], strides = [1, 1]} : vector<2x96xf32> to vector<2x32xf32>
    %82 = arith.mulf %81, %65 : vector<2x32xf32>
    %83 = vector.extract_strided_slice %78 {offsets = [0, 0], sizes = [2, 32], strides = [1, 1]} : vector<2x96xf32> to vector<2x32xf32>
    %84 = arith.mulf %83, %80 : vector<2x32xf32>
    %85 = arith.addf %82, %84 : vector<2x32xf32>
    %86 = vector.extract_strided_slice %78 {offsets = [0, 64], sizes = [2, 32], strides = [1, 1]} : vector<2x96xf32> to vector<2x32xf32>
    %87 = math.tanh %85 : vector<2x32xf32>
    %88 = arith.mulf %86, %87 : vector<2x32xf32>
    %c6_30 = arith.constant 6 : index
    %c0_31 = arith.constant 0 : index
    %89 = vector.load %arg10[%c6_30, %c0_31] : memref<16x32xf32, #tpu.memory_space<vmem>>, vector<2x32xf32>
    tpu.vector_store %arg10[%c6_30, %c0_31], %88 {strides = array<i32>} : memref<16x32xf32, #tpu.memory_space<vmem>>, vector<2x32xf32>,
    %c8 = arith.constant 8 : index
    %c0_32 = arith.constant 0 : index
    %90 = vector.load %arg9[%c8, %c0_32] : memref<16x128xf32, #tpu.memory_space<vmem>>, vector<2x128xf32>
    %cst_33 = arith.constant dense<0.000000e+00> : vector<2x128xf32>
    %91 = tpu.matmul %88, %7, %cst_33 {dimension_numbers = #tpu.dot_dimension_numbers<[1], [0], [0], [1], [0, 0, 1, 1], [], []>} : vector<2x32xf32>, vector<32x128xf32>, vector<2x128xf32> -> vector<2x128xf32>
    %92 = arith.addf %90, %91 : vector<2x128xf32>
    %93 = vector.extract_strided_slice %92 {offsets = [0, 0], sizes = [2, 96], strides = [1, 1]} : vector<2x128xf32> to vector<2x96xf32>
    %94 = arith.negf %93 : vector<2x96xf32>
    %95 = math.exp %94 : vector<2x96xf32>
    %cst_34 = arith.constant 1.000000e+00 : f32
    %96 = vector.broadcast %cst_34 : f32 to vector<2x96xf32>
    %97 = arith.addf %96, %95 : vector<2x96xf32>
    %98 = arith.divf %96, %97 : vector<2x96xf32>
    %99 = vector.extract_strided_slice %92 {offsets = [0, 96], sizes = [2, 32], strides = [1, 1]} : vector<2x128xf32> to vector<2x32xf32>
    %100 = math.tanh %99 : vector<2x32xf32>
    %101 = vector.extract_strided_slice %98 {offsets = [0, 32], sizes = [2, 32], strides = [1, 1]} : vector<2x96xf32> to vector<2x32xf32>
    %102 = arith.mulf %101, %85 : vector<2x32xf32>
    %103 = vector.extract_strided_slice %98 {offsets = [0, 0], sizes = [2, 32], strides = [1, 1]} : vector<2x96xf32> to vector<2x32xf32>
    %104 = arith.mulf %103, %100 : vector<2x32xf32>
    %105 = arith.addf %102, %104 : vector<2x32xf32>
    %106 = vector.extract_strided_slice %98 {offsets = [0, 64], sizes = [2, 32], strides = [1, 1]} : vector<2x96xf32> to vector<2x32xf32>
    %107 = math.tanh %105 : vector<2x32xf32>
    %108 = arith.mulf %106, %107 : vector<2x32xf32>
    %c8_35 = arith.constant 8 : index
    %c0_36 = arith.constant 0 : index
    %109 = vector.load %arg10[%c8_35, %c0_36] : memref<16x32xf32, #tpu.memory_space<vmem>>, vector<2x32xf32>
    tpu.vector_store %arg10[%c8_35, %c0_36], %108 {strides = array<i32>} : memref<16x32xf32, #tpu.memory_space<vmem>>, vector<2x32xf32>,
    %c10 = arith.constant 10 : index
    %c0_37 = arith.constant 0 : index
    %110 = vector.load %arg9[%c10, %c0_37] : memref<16x128xf32, #tpu.memory_space<vmem>>, vector<2x128xf32>
    %cst_38 = arith.constant dense<0.000000e+00> : vector<2x128xf32>
    %111 = tpu.matmul %108, %7, %cst_38 {dimension_numbers = #tpu.dot_dimension_numbers<[1], [0], [0], [1], [0, 0, 1, 1], [], []>} : vector<2x32xf32>, vector<32x128xf32>, vector<2x128xf32> -> vector<2x128xf32>
    %112 = arith.addf %110, %111 : vector<2x128xf32>
    %113 = vector.extract_strided_slice %112 {offsets = [0, 0], sizes = [2, 96], strides = [1, 1]} : vector<2x128xf32> to vector<2x96xf32>
    %114 = arith.negf %113 : vector<2x96xf32>
    %115 = math.exp %114 : vector<2x96xf32>
    %cst_39 = arith.constant 1.000000e+00 : f32
    %116 = vector.broadcast %cst_39 : f32 to vector<2x96xf32>
    %117 = arith.addf %116, %115 : vector<2x96xf32>
    %118 = arith.divf %116, %117 : vector<2x96xf32>
    %119 = vector.extract_strided_slice %112 {offsets = [0, 96], sizes = [2, 32], strides = [1, 1]} : vector<2x128xf32> to vector<2x32xf32>
    %120 = math.tanh %119 : vector<2x32xf32>
    %121 = vector.extract_strided_slice %118 {offsets = [0, 32], sizes = [2, 32], strides = [1, 1]} : vector<2x96xf32> to vector<2x32xf32>
    %122 = arith.mulf %121, %105 : vector<2x32xf32>
    %123 = vector.extract_strided_slice %118 {offsets = [0, 0], sizes = [2, 32], strides = [1, 1]} : vector<2x96xf32> to vector<2x32xf32>
    %124 = arith.mulf %123, %120 : vector<2x32xf32>
    %125 = arith.addf %122, %124 : vector<2x32xf32>
    %126 = vector.extract_strided_slice %118 {offsets = [0, 64], sizes = [2, 32], strides = [1, 1]} : vector<2x96xf32> to vector<2x32xf32>
    %127 = math.tanh %125 : vector<2x32xf32>
    %128 = arith.mulf %126, %127 : vector<2x32xf32>
    %c10_40 = arith.constant 10 : index
    %c0_41 = arith.constant 0 : index
    %129 = vector.load %arg10[%c10_40, %c0_41] : memref<16x32xf32, #tpu.memory_space<vmem>>, vector<2x32xf32>
    tpu.vector_store %arg10[%c10_40, %c0_41], %128 {strides = array<i32>} : memref<16x32xf32, #tpu.memory_space<vmem>>, vector<2x32xf32>,
    %c12 = arith.constant 12 : index
    %c0_42 = arith.constant 0 : index
    %130 = vector.load %arg9[%c12, %c0_42] : memref<16x128xf32, #tpu.memory_space<vmem>>, vector<2x128xf32>
    %cst_43 = arith.constant dense<0.000000e+00> : vector<2x128xf32>
    %131 = tpu.matmul %128, %7, %cst_43 {dimension_numbers = #tpu.dot_dimension_numbers<[1], [0], [0], [1], [0, 0, 1, 1], [], []>} : vector<2x32xf32>, vector<32x128xf32>, vector<2x128xf32> -> vector<2x128xf32>
    %132 = arith.addf %130, %131 : vector<2x128xf32>
    %133 = vector.extract_strided_slice %132 {offsets = [0, 0], sizes = [2, 96], strides = [1, 1]} : vector<2x128xf32> to vector<2x96xf32>
    %134 = arith.negf %133 : vector<2x96xf32>
    %135 = math.exp %134 : vector<2x96xf32>
    %cst_44 = arith.constant 1.000000e+00 : f32
    %136 = vector.broadcast %cst_44 : f32 to vector<2x96xf32>
    %137 = arith.addf %136, %135 : vector<2x96xf32>
    %138 = arith.divf %136, %137 : vector<2x96xf32>
    %139 = vector.extract_strided_slice %132 {offsets = [0, 96], sizes = [2, 32], strides = [1, 1]} : vector<2x128xf32> to vector<2x32xf32>
    %140 = math.tanh %139 : vector<2x32xf32>
    %141 = vector.extract_strided_slice %138 {offsets = [0, 32], sizes = [2, 32], strides = [1, 1]} : vector<2x96xf32> to vector<2x32xf32>
    %142 = arith.mulf %141, %125 : vector<2x32xf32>
    %143 = vector.extract_strided_slice %138 {offsets = [0, 0], sizes = [2, 32], strides = [1, 1]} : vector<2x96xf32> to vector<2x32xf32>
    %144 = arith.mulf %143, %140 : vector<2x32xf32>
    %145 = arith.addf %142, %144 : vector<2x32xf32>
    %146 = vector.extract_strided_slice %138 {offsets = [0, 64], sizes = [2, 32], strides = [1, 1]} : vector<2x96xf32> to vector<2x32xf32>
    %147 = math.tanh %145 : vector<2x32xf32>
    %148 = arith.mulf %146, %147 : vector<2x32xf32>
    %c12_45 = arith.constant 12 : index
    %c0_46 = arith.constant 0 : index
    %149 = vector.load %arg10[%c12_45, %c0_46] : memref<16x32xf32, #tpu.memory_space<vmem>>, vector<2x32xf32>
    tpu.vector_store %arg10[%c12_45, %c0_46], %148 {strides = array<i32>} : memref<16x32xf32, #tpu.memory_space<vmem>>, vector<2x32xf32>,
    %c14 = arith.constant 14 : index
    %c0_47 = arith.constant 0 : index
    %150 = vector.load %arg9[%c14, %c0_47] : memref<16x128xf32, #tpu.memory_space<vmem>>, vector<2x128xf32>
    %cst_48 = arith.constant dense<0.000000e+00> : vector<2x128xf32>
    %151 = tpu.matmul %148, %7, %cst_48 {dimension_numbers = #tpu.dot_dimension_numbers<[1], [0], [0], [1], [0, 0, 1, 1], [], []>} : vector<2x32xf32>, vector<32x128xf32>, vector<2x128xf32> -> vector<2x128xf32>
    %152 = arith.addf %150, %151 : vector<2x128xf32>
    %153 = vector.extract_strided_slice %152 {offsets = [0, 0], sizes = [2, 96], strides = [1, 1]} : vector<2x128xf32> to vector<2x96xf32>
    %154 = arith.negf %153 : vector<2x96xf32>
    %155 = math.exp %154 : vector<2x96xf32>
    %cst_49 = arith.constant 1.000000e+00 : f32
    %156 = vector.broadcast %cst_49 : f32 to vector<2x96xf32>
    %157 = arith.addf %156, %155 : vector<2x96xf32>
    %158 = arith.divf %156, %157 : vector<2x96xf32>
    %159 = vector.extract_strided_slice %152 {offsets = [0, 96], sizes = [2, 32], strides = [1, 1]} : vector<2x128xf32> to vector<2x32xf32>
    %160 = math.tanh %159 : vector<2x32xf32>
    %161 = vector.extract_strided_slice %158 {offsets = [0, 32], sizes = [2, 32], strides = [1, 1]} : vector<2x96xf32> to vector<2x32xf32>
    %162 = arith.mulf %161, %145 : vector<2x32xf32>
    %163 = vector.extract_strided_slice %158 {offsets = [0, 0], sizes = [2, 32], strides = [1, 1]} : vector<2x96xf32> to vector<2x32xf32>
    %164 = arith.mulf %163, %160 : vector<2x32xf32>
    %165 = arith.addf %162, %164 : vector<2x32xf32>
    %166 = vector.extract_strided_slice %158 {offsets = [0, 64], sizes = [2, 32], strides = [1, 1]} : vector<2x96xf32> to vector<2x32xf32>
    %167 = math.tanh %165 : vector<2x32xf32>
    %168 = arith.mulf %166, %167 : vector<2x32xf32>
    %c14_50 = arith.constant 14 : index
    %c0_51 = arith.constant 0 : index
    %169 = vector.load %arg10[%c14_50, %c0_51] : memref<16x32xf32, #tpu.memory_space<vmem>>, vector<2x32xf32>
    tpu.vector_store %arg10[%c14_50, %c0_51], %168 {strides = array<i32>} : memref<16x32xf32, #tpu.memory_space<vmem>>, vector<2x32xf32>,
    %c0_52 = arith.constant 0 : index
    %c0_53 = arith.constant 0 : index
    %c0_54 = arith.constant 0 : index
    %170 = vector.load %arg7[%c0_52, %c0_53, %c0_54] : memref<2x2x32xf32, #tpu.memory_space<vmem>>, vector<1x2x32xf32>
    %171 = vector.shape_cast %170 : vector<1x2x32xf32> to vector<2x32xf32>
    %172 = vector.shape_cast %168 : vector<2x32xf32> to vector<1x2x32xf32>
    tpu.vector_store %arg7[%c0_52, %c0_53, %c0_54], %172 {strides = array<i32>} : memref<2x2x32xf32, #tpu.memory_space<vmem>>, vector<1x2x32xf32>,
    %c0_55 = arith.constant 0 : index
    %c0_56 = arith.constant 0 : index
    %c0_57 = arith.constant 0 : index
    %173 = vector.load %arg8[%c0_55, %c0_56, %c0_57] : memref<2x2x32xf32, #tpu.memory_space<vmem>>, vector<1x2x32xf32>
    %174 = vector.shape_cast %173 : vector<1x2x32xf32> to vector<2x32xf32>
    %175 = vector.shape_cast %165 : vector<2x32xf32> to vector<1x2x32xf32>
    tpu.vector_store %arg8[%c0_55, %c0_56, %c0_57], %175 {strides = array<i32>} : memref<2x2x32xf32, #tpu.memory_space<vmem>>, vector<1x2x32xf32>,
    %c0_58 = arith.constant 0 : index
    %c0_59 = arith.constant 0 : index
    %176 = vector.load %arg10[%c0_58, %c0_59] : memref<16x32xf32, #tpu.memory_space<vmem>>, vector<16x32xf32>
    %c0_60 = arith.constant 0 : index
    %c0_61 = arith.constant 0 : index
    %177 = vector.load %arg4[%c0_60, %c0_61] : memref<32x128xf32, #tpu.memory_space<vmem>>, vector<32x128xf32>
    %cst_62 = arith.constant dense<0.000000e+00> : vector<16x128xf32>
    %178 = tpu.matmul %176, %177, %cst_62 {dimension_numbers = #tpu.dot_dimension_numbers<[1], [0], [0], [1], [0, 0, 1, 1], [], []>} : vector<16x32xf32>, vector<32x128xf32>, vector<16x128xf32> -> vector<16x128xf32>
    %c0_63 = arith.constant 0 : index
    %c0_64 = arith.constant 0 : index
    %179 = vector.load %arg6[%c0_63, %c0_64] : memref<1x128xf32, #tpu.memory_space<vmem>>, vector<1x128xf32>
    %180 = vector.broadcast %179 : vector<1x128xf32> to vector<16x128xf32>
    %181 = arith.addf %178, %180 : vector<16x128xf32>
    %c0_65 = arith.constant 0 : index
    %c0_66 = arith.constant 0 : index
    %182 = vector.load %arg9[%c0_65, %c0_66] : memref<16x128xf32, #tpu.memory_space<vmem>>, vector<16x128xf32>
    tpu.vector_store %arg9[%c0_65, %c0_66], %181 {strides = array<i32>} : memref<16x128xf32, #tpu.memory_space<vmem>>, vector<16x128xf32>,
    %c0_67 = arith.constant 0 : index
    %c0_68 = arith.constant 0 : index
    %183 = vector.load %arg5[%c0_67, %c0_68] : memref<32x128xf32, #tpu.memory_space<vmem>>, vector<32x128xf32>
    %cst_69 = arith.constant 0.000000e+00 : f32
    %184 = vector.broadcast %cst_69 : f32 to vector<2x32xf32>
    %cst_70 = arith.constant 0.000000e+00 : f32
    %185 = vector.broadcast %cst_70 : f32 to vector<2x32xf32>
    %c0_71 = arith.constant 0 : index
    %c0_72 = arith.constant 0 : index
    %186 = vector.load %arg9[%c0_71, %c0_72] : memref<16x128xf32, #tpu.memory_space<vmem>>, vector<2x128xf32>
    %cst_73 = arith.constant dense<0.000000e+00> : vector<2x128xf32>
    %187 = tpu.matmul %184, %183, %cst_73 {dimension_numbers = #tpu.dot_dimension_numbers<[1], [0], [0], [1], [0, 0, 1, 1], [], []>} : vector<2x32xf32>, vector<32x128xf32>, vector<2x128xf32> -> vector<2x128xf32>
    %188 = arith.addf %186, %187 : vector<2x128xf32>
    %189 = vector.extract_strided_slice %188 {offsets = [0, 0], sizes = [2, 96], strides = [1, 1]} : vector<2x128xf32> to vector<2x96xf32>
    %190 = arith.negf %189 : vector<2x96xf32>
    %191 = math.exp %190 : vector<2x96xf32>
    %cst_74 = arith.constant 1.000000e+00 : f32
    %192 = vector.broadcast %cst_74 : f32 to vector<2x96xf32>
    %193 = arith.addf %192, %191 : vector<2x96xf32>
    %194 = arith.divf %192, %193 : vector<2x96xf32>
    %195 = vector.extract_strided_slice %188 {offsets = [0, 96], sizes = [2, 32], strides = [1, 1]} : vector<2x128xf32> to vector<2x32xf32>
    %196 = math.tanh %195 : vector<2x32xf32>
    %197 = vector.extract_strided_slice %194 {offsets = [0, 32], sizes = [2, 32], strides = [1, 1]} : vector<2x96xf32> to vector<2x32xf32>
    %198 = arith.mulf %197, %185 : vector<2x32xf32>
    %199 = vector.extract_strided_slice %194 {offsets = [0, 0], sizes = [2, 32], strides = [1, 1]} : vector<2x96xf32> to vector<2x32xf32>
    %200 = arith.mulf %199, %196 : vector<2x32xf32>
    %201 = arith.addf %198, %200 : vector<2x32xf32>
    %202 = vector.extract_strided_slice %194 {offsets = [0, 64], sizes = [2, 32], strides = [1, 1]} : vector<2x96xf32> to vector<2x32xf32>
    %203 = math.tanh %201 : vector<2x32xf32>
    %204 = arith.mulf %202, %203 : vector<2x32xf32>
    %c2_75 = arith.constant 2 : index
    %c0_76 = arith.constant 0 : index
    %205 = vector.load %arg9[%c2_75, %c0_76] : memref<16x128xf32, #tpu.memory_space<vmem>>, vector<2x128xf32>
    %cst_77 = arith.constant dense<0.000000e+00> : vector<2x128xf32>
    %206 = tpu.matmul %204, %183, %cst_77 {dimension_numbers = #tpu.dot_dimension_numbers<[1], [0], [0], [1], [0, 0, 1, 1], [], []>} : vector<2x32xf32>, vector<32x128xf32>, vector<2x128xf32> -> vector<2x128xf32>
    %207 = arith.addf %205, %206 : vector<2x128xf32>
    %208 = vector.extract_strided_slice %207 {offsets = [0, 0], sizes = [2, 96], strides = [1, 1]} : vector<2x128xf32> to vector<2x96xf32>
    %209 = arith.negf %208 : vector<2x96xf32>
    %210 = math.exp %209 : vector<2x96xf32>
    %cst_78 = arith.constant 1.000000e+00 : f32
    %211 = vector.broadcast %cst_78 : f32 to vector<2x96xf32>
    %212 = arith.addf %211, %210 : vector<2x96xf32>
    %213 = arith.divf %211, %212 : vector<2x96xf32>
    %214 = vector.extract_strided_slice %207 {offsets = [0, 96], sizes = [2, 32], strides = [1, 1]} : vector<2x128xf32> to vector<2x32xf32>
    %215 = math.tanh %214 : vector<2x32xf32>
    %216 = vector.extract_strided_slice %213 {offsets = [0, 32], sizes = [2, 32], strides = [1, 1]} : vector<2x96xf32> to vector<2x32xf32>
    %217 = arith.mulf %216, %201 : vector<2x32xf32>
    %218 = vector.extract_strided_slice %213 {offsets = [0, 0], sizes = [2, 32], strides = [1, 1]} : vector<2x96xf32> to vector<2x32xf32>
    %219 = arith.mulf %218, %215 : vector<2x32xf32>
    %220 = arith.addf %217, %219 : vector<2x32xf32>
    %221 = vector.extract_strided_slice %213 {offsets = [0, 64], sizes = [2, 32], strides = [1, 1]} : vector<2x96xf32> to vector<2x32xf32>
    %222 = math.tanh %220 : vector<2x32xf32>
    %223 = arith.mulf %221, %222 : vector<2x32xf32>
    %c4_79 = arith.constant 4 : index
    %c0_80 = arith.constant 0 : index
    %224 = vector.load %arg9[%c4_79, %c0_80] : memref<16x128xf32, #tpu.memory_space<vmem>>, vector<2x128xf32>
    %cst_81 = arith.constant dense<0.000000e+00> : vector<2x128xf32>
    %225 = tpu.matmul %223, %183, %cst_81 {dimension_numbers = #tpu.dot_dimension_numbers<[1], [0], [0], [1], [0, 0, 1, 1], [], []>} : vector<2x32xf32>, vector<32x128xf32>, vector<2x128xf32> -> vector<2x128xf32>
    %226 = arith.addf %224, %225 : vector<2x128xf32>
    %227 = vector.extract_strided_slice %226 {offsets = [0, 0], sizes = [2, 96], strides = [1, 1]} : vector<2x128xf32> to vector<2x96xf32>
    %228 = arith.negf %227 : vector<2x96xf32>
    %229 = math.exp %228 : vector<2x96xf32>
    %cst_82 = arith.constant 1.000000e+00 : f32
    %230 = vector.broadcast %cst_82 : f32 to vector<2x96xf32>
    %231 = arith.addf %230, %229 : vector<2x96xf32>
    %232 = arith.divf %230, %231 : vector<2x96xf32>
    %233 = vector.extract_strided_slice %226 {offsets = [0, 96], sizes = [2, 32], strides = [1, 1]} : vector<2x128xf32> to vector<2x32xf32>
    %234 = math.tanh %233 : vector<2x32xf32>
    %235 = vector.extract_strided_slice %232 {offsets = [0, 32], sizes = [2, 32], strides = [1, 1]} : vector<2x96xf32> to vector<2x32xf32>
    %236 = arith.mulf %235, %220 : vector<2x32xf32>
    %237 = vector.extract_strided_slice %232 {offsets = [0, 0], sizes = [2, 32], strides = [1, 1]} : vector<2x96xf32> to vector<2x32xf32>
    %238 = arith.mulf %237, %234 : vector<2x32xf32>
    %239 = arith.addf %236, %238 : vector<2x32xf32>
    %240 = vector.extract_strided_slice %232 {offsets = [0, 64], sizes = [2, 32], strides = [1, 1]} : vector<2x96xf32> to vector<2x32xf32>
    %241 = math.tanh %239 : vector<2x32xf32>
    %242 = arith.mulf %240, %241 : vector<2x32xf32>
    %c6_83 = arith.constant 6 : index
    %c0_84 = arith.constant 0 : index
    %243 = vector.load %arg9[%c6_83, %c0_84] : memref<16x128xf32, #tpu.memory_space<vmem>>, vector<2x128xf32>
    %cst_85 = arith.constant dense<0.000000e+00> : vector<2x128xf32>
    %244 = tpu.matmul %242, %183, %cst_85 {dimension_numbers = #tpu.dot_dimension_numbers<[1], [0], [0], [1], [0, 0, 1, 1], [], []>} : vector<2x32xf32>, vector<32x128xf32>, vector<2x128xf32> -> vector<2x128xf32>
    %245 = arith.addf %243, %244 : vector<2x128xf32>
    %246 = vector.extract_strided_slice %245 {offsets = [0, 0], sizes = [2, 96], strides = [1, 1]} : vector<2x128xf32> to vector<2x96xf32>
    %247 = arith.negf %246 : vector<2x96xf32>
    %248 = math.exp %247 : vector<2x96xf32>
    %cst_86 = arith.constant 1.000000e+00 : f32
    %249 = vector.broadcast %cst_86 : f32 to vector<2x96xf32>
    %250 = arith.addf %249, %248 : vector<2x96xf32>
    %251 = arith.divf %249, %250 : vector<2x96xf32>
    %252 = vector.extract_strided_slice %245 {offsets = [0, 96], sizes = [2, 32], strides = [1, 1]} : vector<2x128xf32> to vector<2x32xf32>
    %253 = math.tanh %252 : vector<2x32xf32>
    %254 = vector.extract_strided_slice %251 {offsets = [0, 32], sizes = [2, 32], strides = [1, 1]} : vector<2x96xf32> to vector<2x32xf32>
    %255 = arith.mulf %254, %239 : vector<2x32xf32>
    %256 = vector.extract_strided_slice %251 {offsets = [0, 0], sizes = [2, 32], strides = [1, 1]} : vector<2x96xf32> to vector<2x32xf32>
    %257 = arith.mulf %256, %253 : vector<2x32xf32>
    %258 = arith.addf %255, %257 : vector<2x32xf32>
    %259 = vector.extract_strided_slice %251 {offsets = [0, 64], sizes = [2, 32], strides = [1, 1]} : vector<2x96xf32> to vector<2x32xf32>
    %260 = math.tanh %258 : vector<2x32xf32>
    %261 = arith.mulf %259, %260 : vector<2x32xf32>
    %c8_87 = arith.constant 8 : index
    %c0_88 = arith.constant 0 : index
    %262 = vector.load %arg9[%c8_87, %c0_88] : memref<16x128xf32, #tpu.memory_space<vmem>>, vector<2x128xf32>
    %cst_89 = arith.constant dense<0.000000e+00> : vector<2x128xf32>
    %263 = tpu.matmul %261, %183, %cst_89 {dimension_numbers = #tpu.dot_dimension_numbers<[1], [0], [0], [1], [0, 0, 1, 1], [], []>} : vector<2x32xf32>, vector<32x128xf32>, vector<2x128xf32> -> vector<2x128xf32>
    %264 = arith.addf %262, %263 : vector<2x128xf32>
    %265 = vector.extract_strided_slice %264 {offsets = [0, 0], sizes = [2, 96], strides = [1, 1]} : vector<2x128xf32> to vector<2x96xf32>
    %266 = arith.negf %265 : vector<2x96xf32>
    %267 = math.exp %266 : vector<2x96xf32>
    %cst_90 = arith.constant 1.000000e+00 : f32
    %268 = vector.broadcast %cst_90 : f32 to vector<2x96xf32>
    %269 = arith.addf %268, %267 : vector<2x96xf32>
    %270 = arith.divf %268, %269 : vector<2x96xf32>
    %271 = vector.extract_strided_slice %264 {offsets = [0, 96], sizes = [2, 32], strides = [1, 1]} : vector<2x128xf32> to vector<2x32xf32>
    %272 = math.tanh %271 : vector<2x32xf32>
    %273 = vector.extract_strided_slice %270 {offsets = [0, 32], sizes = [2, 32], strides = [1, 1]} : vector<2x96xf32> to vector<2x32xf32>
    %274 = arith.mulf %273, %258 : vector<2x32xf32>
    %275 = vector.extract_strided_slice %270 {offsets = [0, 0], sizes = [2, 32], strides = [1, 1]} : vector<2x96xf32> to vector<2x32xf32>
    %276 = arith.mulf %275, %272 : vector<2x32xf32>
    %277 = arith.addf %274, %276 : vector<2x32xf32>
    %278 = vector.extract_strided_slice %270 {offsets = [0, 64], sizes = [2, 32], strides = [1, 1]} : vector<2x96xf32> to vector<2x32xf32>
    %279 = math.tanh %277 : vector<2x32xf32>
    %280 = arith.mulf %278, %279 : vector<2x32xf32>
    %c10_91 = arith.constant 10 : index
    %c0_92 = arith.constant 0 : index
    %281 = vector.load %arg9[%c10_91, %c0_92] : memref<16x128xf32, #tpu.memory_space<vmem>>, vector<2x128xf32>
    %cst_93 = arith.constant dense<0.000000e+00> : vector<2x128xf32>
    %282 = tpu.matmul %280, %183, %cst_93 {dimension_numbers = #tpu.dot_dimension_numbers<[1], [0], [0], [1], [0, 0, 1, 1], [], []>} : vector<2x32xf32>, vector<32x128xf32>, vector<2x128xf32> -> vector<2x128xf32>
    %283 = arith.addf %281, %282 : vector<2x128xf32>
    %284 = vector.extract_strided_slice %283 {offsets = [0, 0], sizes = [2, 96], strides = [1, 1]} : vector<2x128xf32> to vector<2x96xf32>
    %285 = arith.negf %284 : vector<2x96xf32>
    %286 = math.exp %285 : vector<2x96xf32>
    %cst_94 = arith.constant 1.000000e+00 : f32
    %287 = vector.broadcast %cst_94 : f32 to vector<2x96xf32>
    %288 = arith.addf %287, %286 : vector<2x96xf32>
    %289 = arith.divf %287, %288 : vector<2x96xf32>
    %290 = vector.extract_strided_slice %283 {offsets = [0, 96], sizes = [2, 32], strides = [1, 1]} : vector<2x128xf32> to vector<2x32xf32>
    %291 = math.tanh %290 : vector<2x32xf32>
    %292 = vector.extract_strided_slice %289 {offsets = [0, 32], sizes = [2, 32], strides = [1, 1]} : vector<2x96xf32> to vector<2x32xf32>
    %293 = arith.mulf %292, %277 : vector<2x32xf32>
    %294 = vector.extract_strided_slice %289 {offsets = [0, 0], sizes = [2, 32], strides = [1, 1]} : vector<2x96xf32> to vector<2x32xf32>
    %295 = arith.mulf %294, %291 : vector<2x32xf32>
    %296 = arith.addf %293, %295 : vector<2x32xf32>
    %297 = vector.extract_strided_slice %289 {offsets = [0, 64], sizes = [2, 32], strides = [1, 1]} : vector<2x96xf32> to vector<2x32xf32>
    %298 = math.tanh %296 : vector<2x32xf32>
    %299 = arith.mulf %297, %298 : vector<2x32xf32>
    %c12_95 = arith.constant 12 : index
    %c0_96 = arith.constant 0 : index
    %300 = vector.load %arg9[%c12_95, %c0_96] : memref<16x128xf32, #tpu.memory_space<vmem>>, vector<2x128xf32>
    %cst_97 = arith.constant dense<0.000000e+00> : vector<2x128xf32>
    %301 = tpu.matmul %299, %183, %cst_97 {dimension_numbers = #tpu.dot_dimension_numbers<[1], [0], [0], [1], [0, 0, 1, 1], [], []>} : vector<2x32xf32>, vector<32x128xf32>, vector<2x128xf32> -> vector<2x128xf32>
    %302 = arith.addf %300, %301 : vector<2x128xf32>
    %303 = vector.extract_strided_slice %302 {offsets = [0, 0], sizes = [2, 96], strides = [1, 1]} : vector<2x128xf32> to vector<2x96xf32>
    %304 = arith.negf %303 : vector<2x96xf32>
    %305 = math.exp %304 : vector<2x96xf32>
    %cst_98 = arith.constant 1.000000e+00 : f32
    %306 = vector.broadcast %cst_98 : f32 to vector<2x96xf32>
    %307 = arith.addf %306, %305 : vector<2x96xf32>
    %308 = arith.divf %306, %307 : vector<2x96xf32>
    %309 = vector.extract_strided_slice %302 {offsets = [0, 96], sizes = [2, 32], strides = [1, 1]} : vector<2x128xf32> to vector<2x32xf32>
    %310 = math.tanh %309 : vector<2x32xf32>
    %311 = vector.extract_strided_slice %308 {offsets = [0, 32], sizes = [2, 32], strides = [1, 1]} : vector<2x96xf32> to vector<2x32xf32>
    %312 = arith.mulf %311, %296 : vector<2x32xf32>
    %313 = vector.extract_strided_slice %308 {offsets = [0, 0], sizes = [2, 32], strides = [1, 1]} : vector<2x96xf32> to vector<2x32xf32>
    %314 = arith.mulf %313, %310 : vector<2x32xf32>
    %315 = arith.addf %312, %314 : vector<2x32xf32>
    %316 = vector.extract_strided_slice %308 {offsets = [0, 64], sizes = [2, 32], strides = [1, 1]} : vector<2x96xf32> to vector<2x32xf32>
    %317 = math.tanh %315 : vector<2x32xf32>
    %318 = arith.mulf %316, %317 : vector<2x32xf32>
    %c14_99 = arith.constant 14 : index
    %c0_100 = arith.constant 0 : index
    %319 = vector.load %arg9[%c14_99, %c0_100] : memref<16x128xf32, #tpu.memory_space<vmem>>, vector<2x128xf32>
    %cst_101 = arith.constant dense<0.000000e+00> : vector<2x128xf32>
    %320 = tpu.matmul %318, %183, %cst_101 {dimension_numbers = #tpu.dot_dimension_numbers<[1], [0], [0], [1], [0, 0, 1, 1], [], []>} : vector<2x32xf32>, vector<32x128xf32>, vector<2x128xf32> -> vector<2x128xf32>
    %321 = arith.addf %319, %320 : vector<2x128xf32>
    %322 = vector.extract_strided_slice %321 {offsets = [0, 0], sizes = [2, 96], strides = [1, 1]} : vector<2x128xf32> to vector<2x96xf32>
    %323 = arith.negf %322 : vector<2x96xf32>
    %324 = math.exp %323 : vector<2x96xf32>
    %cst_102 = arith.constant 1.000000e+00 : f32
    %325 = vector.broadcast %cst_102 : f32 to vector<2x96xf32>
    %326 = arith.addf %325, %324 : vector<2x96xf32>
    %327 = arith.divf %325, %326 : vector<2x96xf32>
    %328 = vector.extract_strided_slice %321 {offsets = [0, 96], sizes = [2, 32], strides = [1, 1]} : vector<2x128xf32> to vector<2x32xf32>
    %329 = math.tanh %328 : vector<2x32xf32>
    %330 = vector.extract_strided_slice %327 {offsets = [0, 32], sizes = [2, 32], strides = [1, 1]} : vector<2x96xf32> to vector<2x32xf32>
    %331 = arith.mulf %330, %315 : vector<2x32xf32>
    %332 = vector.extract_strided_slice %327 {offsets = [0, 0], sizes = [2, 32], strides = [1, 1]} : vector<2x96xf32> to vector<2x32xf32>
    %333 = arith.mulf %332, %329 : vector<2x32xf32>
    %334 = arith.addf %331, %333 : vector<2x32xf32>
    %335 = vector.extract_strided_slice %327 {offsets = [0, 64], sizes = [2, 32], strides = [1, 1]} : vector<2x96xf32> to vector<2x32xf32>
    %336 = math.tanh %334 : vector<2x32xf32>
    %337 = arith.mulf %335, %336 : vector<2x32xf32>
    %c1 = arith.constant 1 : index
    %c0_103 = arith.constant 0 : index
    %c0_104 = arith.constant 0 : index
    %338 = vector.load %arg7[%c1, %c0_103, %c0_104] : memref<2x2x32xf32, #tpu.memory_space<vmem>>, vector<1x2x32xf32>
    %339 = vector.shape_cast %338 : vector<1x2x32xf32> to vector<2x32xf32>
    %340 = vector.shape_cast %337 : vector<2x32xf32> to vector<1x2x32xf32>
    tpu.vector_store %arg7[%c1, %c0_103, %c0_104], %340 {strides = array<i32>} : memref<2x2x32xf32, #tpu.memory_space<vmem>>, vector<1x2x32xf32>,
    %c1_105 = arith.constant 1 : index
    %c0_106 = arith.constant 0 : index
    %c0_107 = arith.constant 0 : index
    %341 = vector.load %arg8[%c1_105, %c0_106, %c0_107] : memref<2x2x32xf32, #tpu.memory_space<vmem>>, vector<1x2x32xf32>
    %342 = vector.shape_cast %341 : vector<1x2x32xf32> to vector<2x32xf32>
    %343 = vector.shape_cast %334 : vector<2x32xf32> to vector<1x2x32xf32>
    tpu.vector_store %arg8[%c1_105, %c0_106, %c0_107], %343 {strides = array<i32>} : memref<2x2x32xf32, #tpu.memory_space<vmem>>, vector<1x2x32xf32>,
    return
  }
}

</mosaic_0001>

<bundles_post_ra>
// kernel: lstm_encoder_forward.1
= control target key start
LH: loop header
LB: loop body
LE: loop exit
PB: predicated region body
PF: predicated region fallthrough
CT: control target
= control target key end

     0   :  { %14 = vsyncpa [#allocation5], 0  ;;  %s2940_s0 = inlined_call_operand.vmem [shape: f32[16,4], index: 0, kind: input, shape index: {}]   ;;  %s2941_s1 = inlined_call_operand.vmem [shape: f32[4,128], index: 1, kind: input, shape index: {}]   ;;  %s2942_s2 = inlined_call_operand.vmem [shape: f32[32,128], index: 2, kind: input, shape index: {}]   ;;  %s2943_s3 = inlined_call_operand.vmem [shape: f32[1,128], index: 3, kind: input, shape index: {}]   ;;  %s2944_s4 = inlined_call_operand.hbm [shape: f32[32,128], index: 4, kind: input, shape index: {}]   ;;  %s2945_s5 = inlined_call_operand.hbm [shape: f32[32,128], index: 5, kind: input, shape index: {}]   ;;  %s2946_s6 = inlined_call_operand.vmem [shape: f32[1,128], index: 6, kind: input, shape index: {}]   ;;  %s2947_s7 = inlined_call_operand.hbm [shape: f32[2,2,32], index: 7, kind: output, shape index: {0}]   ;;  %s2948_s8 = inlined_call_operand.hbm [shape: f32[2,2,32], index: 8, kind: output, shape index: {1}]  }
   0x1   :  { %15 = vsyncpa [#allocation8], 0 }
   0x2   :  { %16 = vsyncpa [#allocation6], 0 }
   0x3   :  { %17 = vsyncpa [#allocation11], 0  ;;  %s2601_s27 = smov [#allocation4]   ;;  %s2505_s9 = scalar_lea.hbm %s2944_s4, 512 }
   0x4   :  { %s31_s28 = sshll.u32 %s2601_s27, 4  ;;  %p2506_p0 = scmp.ne.s32.totalorder %s2944_s4, %s2505_s9  ;;  %s32_s28 = int_to_ptr.vmem [resolvable:$true] %s31_s28 }
   0x5   :  { %p2509_p1 = scmp.lt.u32.totalorder %s2505_s9, %s2944_s4 }
   0x7   :  { %p2511_p2 = pnand %p2509_p1, %p2506_p0 }
   0x9   :  { %2514 = shalt.err (!%p2511_p2)
}
   0xa   :  { %s2515_s14 = scalar_lea.vmem %s32_s28, 512  ;;  %p2520_p4 = scmp.lt.s32.totalorder %s32_s28, %s32_s28 }
   0xb   :  { %p2516_p3 = scmp.ne.s32.totalorder %s32_s28, %s2515_s14  ;;  %p2521_p5 = scmp.lt.s32.totalorder %s2515_s14, %s2515_s14 }
   0xd   :  { %p2522_p6 = por %p2521_p5, %p2520_p4 }
   0xf   :  { %p2523_p7 = pnand %p2522_p6, %p2516_p3 }
  0x11   :  { %2526 = shalt.err (!%p2523_p7)
}
  0x12   :  { %s2602_s15 = smov 128   ;;  %s2603_s16 = smov 8  }
  0x13   :  { %37 = dma.hbm_to_vmem [thread:$0]  %s2944_s4, 512, %s32_s28, [#allocation5], %s2602_s15, %s2602_s15, %s2603_s16  }
  0x14   :  { %s2604_s19 = smov [#allocation7]   ;;  %s2527_s23 = scalar_lea.hbm %s2945_s5, 512 }
  0x15   :  { %s43_s20 = sshll.u32 %s2604_s19, 4  ;;  %p2528_p8 = scmp.ne.s32.totalorder %s2945_s5, %s2527_s23  ;;  %s44_s20 = int_to_ptr.vmem [resolvable:$true] %s43_s20 }
  0x16   :  { %p2531_p9 = scmp.lt.u32.totalorder %s2527_s23, %s2945_s5 }
  0x18   :  { %p2533_p10 = pnand %p2531_p9, %p2528_p8 }
  0x1a   :  { %2536 = shalt.err (!%p2533_p10)
}
  0x1b   :  { %s2537_s29 = scalar_lea.vmem %s44_s20, 512  ;;  %p2542_p12 = scmp.lt.s32.totalorder %s44_s20, %s44_s20 }
  0x1c   :  { %p2538_p11 = scmp.ne.s32.totalorder %s44_s20, %s2537_s29  ;;  %p2543_p13 = scmp.lt.s32.totalorder %s2537_s29, %s2537_s29 }
  0x1e   :  { %p2544_p0 = por %p2543_p13, %p2542_p12 }
  0x20   :  { %p2545_p1 = pnand %p2544_p0, %p2538_p11 }
  0x22   :  { %2548 = shalt.err (!%p2545_p1)
}
  0x23   :  { %49 = dma.hbm_to_vmem [thread:$0]  %s2945_s5, 512, %s44_s20, [#allocation8], %s2602_s15, %s2602_s15, %s2603_s16  }
  0x24   :  { %2593 = dma.done.wait [#allocation5], 512  }
  0x25   :  { %2594 = vsyncadd [#allocation5], 4294966784 }
  0x26   :  { %2595 = dma.done.wait [#allocation8], 512  }
  0x27   :  { %2596 = vsyncadd [#allocation8], 4294966784  ;;  %v2605_v0 = vmov 0.0|0.0   ;;  %vm2606_vm0 = vmmov 0   ;;  %v2607_v1 = vmov 0.0   ;;  %vm75_vm1 = vcmask 1043456  }
  0x28   :  { %2260 = vmatprep.subr.bf16.mxu1 %v2605_v0  ;;  %2081 = vmatprep.mubr.msk.f32.mxu1 %vm2606_vm0, %v2607_v1  ;;  %vm68_vm2 = vcmask 31744   ;;  %v60_v2 = vld [vmem:[%s2941_s1] sm:$0xf]  ;;  %v59_v4 = vld [vmem:[%s2940_s0 + $0x8] sm:$0xff]  ;;  %v158_v7 = vld [vmem:[%s2942_s2 + $0x10] sm:$0xff]  ;;  %s2608_s20 = smov 32  }
  0x29   :  { %v58_v3 = vld [vmem:[%s2940_s0] sm:$0xff]  ;;  %2068 = vmatprep.subr.msk.mxu0 %vm75_vm1, %v60_v2  ;;  %v157_v6 = vld [vmem:[%s2942_s2 + $0x8] sm:$0xff]  ;;  %v159_v9 = vld [vmem:[%s2942_s2 + $0x18] sm:$0xff]  ;;  %vm264_vm3 = vcmask 254976   ;;  %vm161_vm4 = vcmask 261120   ;;  %s2611_s23 = smov [#allocation10]  }
  0x2a   :  { %2070 = vmatprep.mubr.msk.f32.mxu0 %vm68_vm2, %v58_v3  ;;  %v156_v5 = vld [vmem:[%s2942_s2] sm:$0xff]  ;;  %2069 = vmatpush3.msk.msra.mxu0 %vm75_vm1, %v60_v2  ;;  %v2711_v10 = vpack.c.bf16 %v159_v9, %v158_v7  ;;  %s1925_s24 = sshll.u32 %s2611_s23, 4  ;;  %s1926_s24 = int_to_ptr.vmem [resolvable:$true] %s1925_s24 }
  0x2b   :  { %v2704_v8 = vpack.c.bf16 %v157_v6, %v156_v5  ;;  %2071 = vmatmul.mubr.msk.f32.vlgmr.msra.gmra.mrb[0].mxu0 %vm68_vm2, %v59_v4  ;;  %2266 = vmatprep.subr.bf16.mxu0 %v2605_v0  ;;  %v1942_v11 = vld [vmem:[%s2943_s3] ss:$0 sm:$0xff]  ;;  %s2609_s3 = smov 64   ;;  %s2549_s25 = scalar_lea.vmem %s1926_s24, 64 }
  0x2c   :  { %2092 = vmatprep.mubr.msk.f32.mxu0 %vm2606_vm0, %v2607_v1  ;;  %p2550_p2 = scmp.ne.s32.totalorder %s1926_s24, %s2549_s25  ;;  %p2554_p3 = scmp.lt.s32.totalorder %s1926_s24, %s1926_s24 }
  0x2d   :  { %2262 = vmatpush3.bf16.msra.mxu1 %v2704_v8  ;;  %2268 = vmatpush3.bf16.msra.mxu0 %v2704_v8  ;;  %p2555_p4 = scmp.lt.s32.totalorder %s2549_s25, %s2549_s25 }
  0x2e   :  { %2263 = vmatprep.subr.bf16.mxu1 %v2605_v0  ;;  %2269 = vmatprep.subr.bf16.mxu0 %v2605_v0 }
  0x2f   :  { %p2556_p5 = por %p2555_p4, %p2554_p3 }
  0x31   :  { %2265 = vmatpush3.bf16.msra.mxu1 %v2711_v10  ;;  %2271 = vmatpush3.bf16.msra.mxu0 %v2711_v10  ;;  %p2557_p6 = pnand %p2556_p5, %p2550_p2 }
  0x32   :  { %2272 = vmatprep.subr.bf16.mxu1 %v2605_v0  ;;  %2278 = vmatprep.subr.bf16.mxu0 %v2605_v0 }
  0x34   :  { %2082 = vmatmul.mubr.f32.vlgmr.msra.gmra.mrb[0].mxu1 %v2607_v1 }
  0x35   :  { %2274 = vmatpush3.bf16.msra.mxu1 %v2704_v8  ;;  %2103 = vmatprep.mubr.msk.f32.mxu1 %vm2606_vm0, %v2607_v1 }
  0x36   :  { %2275 = vmatprep.subr.bf16.mxu1 %v2605_v0 }
  0x39   :  { %2277 = vmatpush3.bf16.msra.mxu1 %v2711_v10 }
  0x3a   :  { %2284 = vmatprep.subr.bf16.mxu1 %v2605_v0 }
  0xfe   :  { %v2072_v12 = vpop.f32.mrb[0].mxu0 }
  0xff   :  { %v151_v13 = vadd.f32 %v2072_v12, %v1942_v11  ;;  %v145_v14 = vpop.f32.mrb[1].mxu0 }
 0x100   :  { %v146_v15 = vadd.f32 %v1942_v11, %v145_v14 }
 0x101   :  { %155 = vst [vmem:[#allocation2 + $0x8] sm:$0xff] %v151_v13 }
 0x102   :  { %154 = vst [vmem:[#allocation2] sm:$0xff] %v146_v15 }
 0x107   :  { %v231_v16 = vpop.f32.mrb[0].mxu1 }
 0x108   :  { %v2083_v17 = vpop.f32.mrb[1].mxu1 }
 0x109   :  { %v160_v18 = vld [vmem:[#allocation2] sm:$0x3]  ;;  %v266_v34 = vld [vmem:[#allocation2 + $0x2] sm:$0x3]  ;;  %v369_v52 = vld [vmem:[#allocation2 + $0x4] sm:$0x3] }
 0x10a   :  { %v235_v19 = vadd.f32 %v231_v16, %v160_v18  ;;  %v472_v9 = vld [vmem:[#allocation2 + $0x6] sm:$0x3] }
 0x10c   :  { %2377 = vtanh.f32 %v235_v19  ;;  %v1946_v21 = vmul.f32 -1.442695, %v235_v19 }
 0x10e   :  { %2379 = vpow2.f32 %v1946_v21 }
 0x116   :  { %v2378_v20 = vpop.eup %2377 }
 0x117   :  { %245 = vrot.lane.b32.xlu0 %v2378_v20, %s2608_s20 }
 0x118   :  { %v2380_v22 = vpop.eup %2379 }
 0x119   :  { %v239_v23 = vadd.f32 1.0, %v2380_v22 }
 0x11b   :  { %2381 = vrcp.f32 %v239_v23 }
 0x125   :  { %v2382_v24 = vpop.eup %2381 }
 0x126   :  { %v243_v27 = vmul.f32 0.0, %v2382_v24 }
 0x189   :  { %v246_v25 = vpop.permute.xlu0 %245 }
 0x18a   :  { %v248_v26 = vmul.f32 %v2382_v24, %v246_v25 }
 0x18c   :  { %250 = vrot.lane.b32.xlu0 %v248_v26, %s2608_s20 }
 0x1fe   :  { %v251_v28 = vpop.permute.xlu0 %250 }
 0x1ff   :  { %v253_v29 = vadd.f32 %v251_v28, %v243_v27  ;;  %v575_v28 = vld [vmem:[#allocation2 + $0x8] sm:$0x3] }
 0x201   :  { %2383 = vtanh.f32 %v253_v29 }
 0x20b   :  { %v2384_v30 = vpop.eup %2383 }
 0x20c   :  { %256 = vrot.lane.b32.xlu1 %v2384_v30, %s2608_s20 }
 0x27e   :  { %v257_v31 = vpop.permute.xlu1 %256 }
 0x27f   :  { %v259_v32 = vmul.f32 %v2382_v24, %v257_v31 }
 0x281   :  { %261 = vrot.lane.b32.xlu1 %v259_v32, %s2609_s3 }
 0x2f3   :  { %v262_v33 = vpop.permute.xlu1 %261 }
 0x2f4   :  { %265 = vst.msk [vmem:[#allocation3] sm:$0x3] %vm264_vm3, %v262_v33  ;;  %2093 = vmatmul.mubr.msk.f32.vlgmr.msra.gmra.mrb[2].mxu0 %vm161_vm4, %v262_v33 }
 0x2f5   :  { %2280 = vmatpush3.bf16.msra.mxu0 %v2704_v8  ;;  %2114 = vmatprep.mubr.msk.f32.mxu0 %vm2606_vm0, %v2607_v1 }
 0x2f6   :  { %2281 = vmatprep.subr.bf16.mxu0 %v2605_v0 }
 0x2f9   :  { %2283 = vmatpush3.bf16.msra.mxu0 %v2711_v10 }
 0x2fa   :  { %2290 = vmatprep.subr.bf16.mxu0 %v2605_v0 }
 0x3c7   :  { %v335_v35 = vpop.f32.mrb[2].mxu0 }
 0x3c8   :  { %v339_v36 = vadd.f32 %v335_v35, %v266_v34  ;;  %v2094_v37 = vpop.f32.mrb[3].mxu0 }
 0x3ca   :  { %2385 = vtanh.f32 %v339_v36  ;;  %v1948_v39 = vmul.f32 -1.442695, %v339_v36 }
 0x3cc   :  { %2387 = vpow2.f32 %v1948_v39 }
 0x3d4   :  { %v2386_v38 = vpop.eup %2385 }
 0x3d5   :  { %349 = vrot.lane.b32.xlu0 %v2386_v38, %s2608_s20 }
 0x3d6   :  { %v2388_v40 = vpop.eup %2387 }
 0x3d7   :  { %v343_v41 = vadd.f32 1.0, %v2388_v40 }
 0x3d9   :  { %2389 = vrcp.f32 %v343_v41 }
 0x3e3   :  { %v2390_v42 = vpop.eup %2389 }
 0x3e4   :  { %v347_v45 = vmul.f32 %v2390_v42, %v253_v29 }
 0x447   :  { %v350_v43 = vpop.permute.xlu0 %349 }
 0x448   :  { %v352_v44 = vmul.f32 %v2390_v42, %v350_v43 }
 0x44a   :  { %354 = vrot.lane.b32.xlu1 %v352_v44, %s2608_s20 }
 0x4bc   :  { %v355_v46 = vpop.permute.xlu1 %354 }
 0x4bd   :  { %v357_v47 = vadd.f32 %v355_v46, %v347_v45  ;;  %v678_v46 = vld [vmem:[#allocation2 + $0xa] sm:$0x3] }
 0x4bf   :  { %2391 = vtanh.f32 %v357_v47 }
 0x4c9   :  { %v2392_v48 = vpop.eup %2391 }
 0x4ca   :  { %360 = vrot.lane.b32.xlu0 %v2392_v48, %s2608_s20 }
 0x53c   :  { %v361_v49 = vpop.permute.xlu0 %360 }
 0x53d   :  { %v363_v50 = vmul.f32 %v2390_v42, %v361_v49 }
 0x53f   :  { %365 = vrot.lane.b32.xlu1 %v363_v50, %s2609_s3 }
 0x5b1   :  { %v366_v51 = vpop.permute.xlu1 %365 }
 0x5b2   :  { %368 = vst.msk [vmem:[#allocation3 + $0x2] sm:$0x3] %vm264_vm3, %v366_v51  ;;  %2104 = vmatmul.mubr.msk.f32.vlgmr.msra.gmra.mrb[2].mxu1 %vm161_vm4, %v366_v51 }
 0x5b3   :  { %2286 = vmatpush3.bf16.msra.mxu1 %v2704_v8  ;;  %2125 = vmatprep.mubr.msk.f32.mxu1 %vm2606_vm0, %v2607_v1 }
 0x5b4   :  { %2287 = vmatprep.subr.bf16.mxu1 %v2605_v0 }
 0x5b7   :  { %2289 = vmatpush3.bf16.msra.mxu1 %v2711_v10 }
 0x5b8   :  { %2296 = vmatprep.subr.bf16.mxu1 %v2605_v0 }
 0x685   :  { %v438_v53 = vpop.f32.mrb[2].mxu1 }
 0x686   :  { %v442_v54 = vadd.f32 %v438_v53, %v369_v52  ;;  %v2105_v55 = vpop.f32.mrb[3].mxu1 }
 0x688   :  { %2393 = vtanh.f32 %v442_v54  ;;  %v1950_v57 = vmul.f32 -1.442695, %v442_v54 }
 0x68a   :  { %2395 = vpow2.f32 %v1950_v57 }
 0x692   :  { %v2394_v56 = vpop.eup %2393 }
 0x693   :  { %452 = vrot.lane.b32.xlu0 %v2394_v56, %s2608_s20 }
 0x694   :  { %v2396_v58 = vpop.eup %2395 }
 0x695   :  { %v446_v59 = vadd.f32 1.0, %v2396_v58 }
 0x697   :  { %2397 = vrcp.f32 %v446_v59 }
 0x6a1   :  { %v2398_v60 = vpop.eup %2397 }
 0x6a2   :  { %v450_v63 = vmul.f32 %v2398_v60, %v357_v47 }
 0x705   :  { %v453_v61 = vpop.permute.xlu0 %452 }
 0x706   :  { %v455_v62 = vmul.f32 %v2398_v60, %v453_v61 }
 0x708   :  { %457 = vrot.lane.b32.xlu1 %v455_v62, %s2608_s20 }
 0x77a   :  { %v458_v2 = vpop.permute.xlu1 %457 }
 0x77b   :  { %v460_v3 = vadd.f32 %v458_v2, %v450_v63  ;;  %v781_v63 = vld [vmem:[#allocation2 + $0xc] sm:$0x3] }
 0x77d   :  { %2399 = vtanh.f32 %v460_v3 }
 0x787   :  { %v2400_v4 = vpop.eup %2399 }
 0x788   :  { %463 = vrot.lane.b32.xlu0 %v2400_v4, %s2608_s20 }
 0x7fa   :  { %v464_v5 = vpop.permute.xlu0 %463 }
 0x7fb   :  { %v466_v6 = vmul.f32 %v2398_v60, %v464_v5 }
 0x7fd   :  { %468 = vrot.lane.b32.xlu1 %v466_v6, %s2609_s3 }
 0x86f   :  { %v469_v7 = vpop.permute.xlu1 %468 }
 0x870   :  { %471 = vst.msk [vmem:[#allocation3 + $0x4] sm:$0x3] %vm264_vm3, %v469_v7  ;;  %2115 = vmatmul.mubr.msk.f32.vlgmr.msra.gmra.mrb[4].mxu0 %vm161_vm4, %v469_v7 }
 0x871   :  { %2292 = vmatpush3.bf16.msra.mxu0 %v2704_v8  ;;  %2136 = vmatprep.mubr.msk.f32.mxu0 %vm2606_vm0, %v2607_v1 }
 0x872   :  { %2293 = vmatprep.subr.bf16.mxu0 %v2605_v0 }
 0x875   :  { %2295 = vmatpush3.bf16.msra.mxu0 %v2711_v10 }
 0x876   :  { %2302 = vmatprep.subr.bf16.mxu0 %v2605_v0 }
 0x943   :  { %v541_v11 = vpop.f32.mrb[4].mxu0 }
 0x944   :  { %v545_v12 = vadd.f32 %v541_v11, %v472_v9  ;;  %v2116_v13 = vpop.f32.mrb[5].mxu0 }
 0x946   :  { %2401 = vtanh.f32 %v545_v12  ;;  %v1952_v15 = vmul.f32 -1.442695, %v545_v12 }
 0x948   :  { %2403 = vpow2.f32 %v1952_v15 }
 0x950   :  { %v2402_v14 = vpop.eup %2401 }
 0x951   :  { %555 = vrot.lane.b32.xlu0 %v2402_v14, %s2608_s20 }
 0x952   :  { %v2404_v16 = vpop.eup %2403 }
 0x953   :  { %v549_v17 = vadd.f32 1.0, %v2404_v16 }
 0x955   :  { %2405 = vrcp.f32 %v549_v17 }
 0x95f   :  { %v2406_v18 = vpop.eup %2405 }
 0x960   :  { %v553_v21 = vmul.f32 %v2406_v18, %v460_v3 }
 0x9c3   :  { %v556_v19 = vpop.permute.xlu0 %555 }
 0x9c4   :  { %v558_v20 = vmul.f32 %v2406_v18, %v556_v19 }
 0x9c6   :  { %560 = vrot.lane.b32.xlu1 %v558_v20, %s2608_s20 }
 0xa38   :  { %v561_v22 = vpop.permute.xlu1 %560 }
 0xa39   :  { %v563_v23 = vadd.f32 %v561_v22, %v553_v21  ;;  %v884_v21 = vld [vmem:[#allocation2 + $0xe] sm:$0x3] }
 0xa3b   :  { %2407 = vtanh.f32 %v563_v23 }
 0xa45   :  { %v2408_v24 = vpop.eup %2407 }
 0xa46   :  { %566 = vrot.lane.b32.xlu0 %v2408_v24, %s2608_s20 }
 0xab8   :  { %v567_v25 = vpop.permute.xlu0 %566 }
 0xab9   :  { %v569_v26 = vmul.f32 %v2406_v18, %v567_v25 }
 0xabb   :  { %571 = vrot.lane.b32.xlu1 %v569_v26, %s2609_s3 }
 0xb2d   :  { %v572_v27 = vpop.permute.xlu1 %571 }
 0xb2e   :  { %574 = vst.msk [vmem:[#allocation3 + $0x6] sm:$0x3] %vm264_vm3, %v572_v27  ;;  %2126 = vmatmul.mubr.msk.f32.vlgmr.msra.gmra.mrb[4].mxu1 %vm161_vm4, %v572_v27 }
 0xb2f   :  { %2298 = vmatpush3.bf16.msra.mxu1 %v2704_v8  ;;  %2147 = vmatprep.mubr.msk.f32.mxu1 %vm2606_vm0, %v2607_v1 }
 0xb30   :  { %2299 = vmatprep.subr.bf16.mxu1 %v2605_v0 }
 0xb33   :  { %2301 = vmatpush3.bf16.msra.mxu1 %v2711_v10 }
 0xb35   :  { %v993_v62 = vld [vmem:[#allocation3] sm:$0xff] }
 0xc01   :  { %v644_v29 = vpop.f32.mrb[4].mxu1 }
 0xc02   :  { %v648_v30 = vadd.f32 %v644_v29, %v575_v28  ;;  %v2127_v31 = vpop.f32.mrb[5].mxu1 }
 0xc04   :  { %2409 = vtanh.f32 %v648_v30  ;;  %v1954_v33 = vmul.f32 -1.442695, %v648_v30 }
 0xc06   :  { %2411 = vpow2.f32 %v1954_v33 }
 0xc0e   :  { %v2410_v32 = vpop.eup %2409 }
 0xc0f   :  { %658 = vrot.lane.b32.xlu0 %v2410_v32, %s2608_s20 }
 0xc10   :  { %v2412_v34 = vpop.eup %2411 }
 0xc11   :  { %v652_v35 = vadd.f32 1.0, %v2412_v34 }
 0xc13   :  { %2413 = vrcp.f32 %v652_v35 }
 0xc1d   :  { %v2414_v36 = vpop.eup %2413 }
 0xc1e   :  { %v656_v39 = vmul.f32 %v2414_v36, %v563_v23 }
 0xc81   :  { %v659_v37 = vpop.permute.xlu0 %658 }
 0xc82   :  { %v661_v38 = vmul.f32 %v2414_v36, %v659_v37  ;;  %v996_v37 = vld [vmem:[#allocation4 + $0x8] sm:$0xff] }
 0xc84   :  { %663 = vrot.lane.b32.xlu1 %v661_v38, %s2608_s20 }
 0xcf6   :  { %v664_v40 = vpop.permute.xlu1 %663 }
 0xcf7   :  { %v666_v41 = vadd.f32 %v664_v40, %v656_v39  ;;  %v997_v39 = vld [vmem:[#allocation4 + $0x10] sm:$0xff]  ;;  %v998_v40 = vld [vmem:[#allocation4 + $0x18] sm:$0xff] }
 0xcf9   :  { %2415 = vtanh.f32 %v666_v41 }
 0xd03   :  { %v2416_v42 = vpop.eup %2415 }
 0xd04   :  { %669 = vrot.lane.b32.xlu0 %v2416_v42, %s2608_s20  ;;  %v1089_v42 = vld [vmem:[#allocation7] sm:$0xff] }
 0xd76   :  { %v670_v43 = vpop.permute.xlu0 %669 }
 0xd77   :  { %v672_v44 = vmul.f32 %v2414_v36, %v670_v43  ;;  %v995_v36 = vld [vmem:[#allocation4] sm:$0xff]  ;;  %v1090_v43 = vld [vmem:[#allocation7 + $0x8] sm:$0xff] }
 0xd78   :  { %v2308_v38 = vpack.c.bf16 %v996_v37, %v995_v36 }
 0xd79   :  { %674 = vrot.lane.b32.xlu1 %v672_v44, %s2609_s3  ;;  %v1091_v44 = vld [vmem:[#allocation7 + $0x10] sm:$0xff] }
 0xd7a   :  { %2309 = vmatprep.subr.bf16.mxu1 %v2308_v38 }
 0xdeb   :  { %v675_v45 = vpop.permute.xlu1 %674 }
 0xdec   :  { %677 = vst.msk [vmem:[#allocation3 + $0x8] sm:$0x3] %vm264_vm3, %v675_v45  ;;  %2137 = vmatmul.mubr.msk.f32.vlgmr.msra.gmra.mrb[6].mxu0 %vm161_vm4, %v675_v45  ;;  %v2813_v45 = vpack.c.bf16 %v1090_v43, %v1089_v42 }
 0xded   :  { %2304 = vmatpush3.bf16.msra.mxu0 %v2704_v8  ;;  %2158 = vmatprep.mubr.msk.f32.mxu0 %vm2606_vm0, %v2607_v1 }
 0xdee   :  { %2305 = vmatprep.subr.bf16.mxu0 %v2605_v0 }
 0xdf1   :  { %2307 = vmatpush3.bf16.msra.mxu0 %v2711_v10 }
 0xdf2   :  { %2316 = vmatprep.subr.bf16.mxu0 %v2605_v0 }
 0xebf   :  { %v747_v47 = vpop.f32.mrb[6].mxu0 }
 0xec0   :  { %v751_v48 = vadd.f32 %v747_v47, %v678_v46  ;;  %v2138_v49 = vpop.f32.mrb[7].mxu0  ;;  %v1092_v46 = vld [vmem:[#allocation7 + $0x18] sm:$0xff] }
 0xec1   :  { %v2816_v49 = vpack.c.bf16 %v1092_v46, %v1091_v44 }
 0xec2   :  { %2417 = vtanh.f32 %v751_v48  ;;  %v1956_v51 = vmul.f32 -1.442695, %v751_v48 }
 0xec4   :  { %2419 = vpow2.f32 %v1956_v51 }
 0xecc   :  { %v2418_v50 = vpop.eup %2417 }
 0xecd   :  { %761 = vrot.lane.b32.xlu0 %v2418_v50, %s2608_s20 }
 0xece   :  { %v2420_v8 = vpop.eup %2419 }
 0xecf   :  { %v755_v52 = vadd.f32 1.0, %v2420_v8 }
 0xed1   :  { %2421 = vrcp.f32 %v755_v52 }
 0xedb   :  { %v2422_v53 = vpop.eup %2421 }
 0xedc   :  { %v759_v10 = vmul.f32 %v2422_v53, %v666_v41  ;;  %v2312_v41 = vpack.c.bf16 %v998_v40, %v997_v39 }
 0xf3f   :  { %v762_v54 = vpop.permute.xlu0 %761 }
 0xf40   :  { %v764_v55 = vmul.f32 %v2422_v53, %v762_v54 }
 0xf42   :  { %766 = vrot.lane.b32.xlu1 %v764_v55, %s2608_s20 }
 0xfb4   :  { %v767_v56 = vpop.permute.xlu1 %766 }
 0xfb5   :  { %v769_v57 = vadd.f32 %v767_v56, %v759_v10 }
 0xfb7   :  { %2423 = vtanh.f32 %v769_v57 }
 0xfc1   :  { %v2424_v58 = vpop.eup %2423 }
 0xfc2   :  { %772 = vrot.lane.b32.xlu0 %v2424_v58, %s2608_s20 }
0x1034   :  { %v773_v59 = vpop.permute.xlu0 %772 }
0x1035   :  { %v775_v60 = vmul.f32 %v2422_v53, %v773_v59  ;;  %v1961_v53 = vld [vmem:[%s2946_s6] ss:$0 sm:$0xff]  ;;  %s2610_s6 = smov 96  }
0x1037   :  { %777 = vrot.lane.b32.xlu1 %v775_v60, %s2609_s3 }
0x10a9   :  { %v778_v61 = vpop.permute.xlu1 %777 }
0x10aa   :  { %780 = vst.msk [vmem:[#allocation3 + $0xa] sm:$0x3] %vm264_vm3, %v778_v61  ;;  %2148 = vmatmul.mubr.msk.f32.vlgmr.msra.gmra.mrb[6].mxu1 %vm161_vm4, %v778_v61 }
0x10ab   :  { %2169 = vmatprep.mubr.msk.f32.mxu1 %vm161_vm4, %v993_v62  ;;  %2311 = vmatpush3.bf16.msra.mxu1 %v2308_v38 }
0x10ac   :  { %2313 = vmatprep.subr.bf16.mxu1 %v2312_v41 }
0x10af   :  { %2315 = vmatpush3.bf16.msra.mxu1 %v2312_v41 }
0x10b0   :  { %2322 = vmatprep.subr.bf16.mxu1 %v2605_v0 }
0x117d   :  { %v850_v2 = vpop.f32.mrb[6].mxu1 }
0x117e   :  { %v854_v3 = vadd.f32 %v850_v2, %v781_v63  ;;  %v2149_v4 = vpop.f32.mrb[7].mxu1 }
0x1180   :  { %2425 = vtanh.f32 %v854_v3  ;;  %v1958_v6 = vmul.f32 -1.442695, %v854_v3 }
0x1182   :  { %2427 = vpow2.f32 %v1958_v6 }
0x118a   :  { %v2426_v5 = vpop.eup %2425 }
0x118b   :  { %864 = vrot.lane.b32.xlu0 %v2426_v5, %s2608_s20 }
0x118c   :  { %v2428_v7 = vpop.eup %2427 }
0x118d   :  { %v858_v9 = vadd.f32 1.0, %v2428_v7 }
0x118f   :  { %2429 = vrcp.f32 %v858_v9 }
0x1199   :  { %v2430_v11 = vpop.eup %2429 }
0x119a   :  { %v862_v14 = vmul.f32 %v2430_v11, %v769_v57 }
0x11fd   :  { %v865_v12 = vpop.permute.xlu0 %864 }
0x11fe   :  { %v867_v13 = vmul.f32 %v2430_v11, %v865_v12 }
0x1200   :  { %869 = vrot.lane.b32.xlu1 %v867_v13, %s2608_s20 }
0x1272   :  { %v870_v15 = vpop.permute.xlu1 %869 }
0x1273   :  { %v872_v16 = vadd.f32 %v870_v15, %v862_v14 }
0x1275   :  { %2431 = vtanh.f32 %v872_v16 }
0x127f   :  { %v2432_v17 = vpop.eup %2431 }
0x1280   :  { %875 = vrot.lane.b32.xlu0 %v2432_v17, %s2608_s20 }
0x12f2   :  { %v876_v18 = vpop.permute.xlu0 %875 }
0x12f3   :  { %v878_v19 = vmul.f32 %v2430_v11, %v876_v18 }
0x12f5   :  { %880 = vrot.lane.b32.xlu1 %v878_v19, %s2609_s3 }
0x1367   :  { %v881_v20 = vpop.permute.xlu1 %880 }
0x1368   :  { %883 = vst.msk [vmem:[#allocation3 + $0xc] sm:$0x3] %vm264_vm3, %v881_v20  ;;  %2159 = vmatmul.mubr.msk.f32.vlgmr.msra.gmra.mrb[8].mxu0 %vm161_vm4, %v881_v20 }
0x1369   :  { %2180 = vmatprep.mubr.msk.f32.mxu0 %vm2606_vm0, %v2607_v1  ;;  %2318 = vmatpush3.bf16.msra.mxu0 %v2813_v45 }
0x136a   :  { %2319 = vmatprep.subr.bf16.mxu0 %v2605_v0 }
0x136d   :  { %2321 = vmatpush3.bf16.msra.mxu0 %v2816_v49 }
0x136e   :  { %2328 = vmatprep.subr.bf16.mxu0 %v2605_v0 }
0x1370   :  { %2181 = vmatmul.mubr.f32.vlgmr.msra.gmra.mrb[10].mxu0 %v2607_v1 }
0x1371   :  { %2330 = vmatpush3.bf16.msra.mxu0 %v2813_v45  ;;  %2202 = vmatprep.mubr.msk.f32.mxu0 %vm2606_vm0, %v2607_v1 }
0x1372   :  { %2331 = vmatprep.subr.bf16.mxu0 %v2605_v0 }
0x1375   :  { %2333 = vmatpush3.bf16.msra.mxu0 %v2816_v49 }
0x1376   :  { %2340 = vmatprep.subr.bf16.mxu0 %v2605_v0 }
0x143b   :  { %v953_v22 = vpop.f32.mrb[8].mxu0 }
0x143c   :  { %v957_v23 = vadd.f32 %v953_v22, %v884_v21  ;;  %v2160_v24 = vpop.f32.mrb[9].mxu0 }
0x143e   :  { %2433 = vtanh.f32 %v957_v23  ;;  %v1960_v26 = vmul.f32 -1.442695, %v957_v23 }
0x1440   :  { %2435 = vpow2.f32 %v1960_v26 }
0x1443   :  { %v1160_v8 = vpop.f32.mrb[10].mxu0 }
0x1444   :  { %v2182_v52 = vpop.f32.mrb[11].mxu0 }
0x1448   :  { %v2434_v25 = vpop.eup %2433 }
0x1449   :  { %967 = vrot.lane.b32.xlu0 %v2434_v25, %s2608_s20 }
0x144a   :  { %v2436_v27 = vpop.eup %2435 }
0x144b   :  { %v961_v28 = vadd.f32 1.0, %v2436_v27 }
0x144d   :  { %2437 = vrcp.f32 %v961_v28 }
0x1457   :  { %v2438_v29 = vpop.eup %2437 }
0x1458   :  { %v965_v32 = vmul.f32 %v2438_v29, %v872_v16 }
0x14bb   :  { %v968_v30 = vpop.permute.xlu0 %967 }
0x14bc   :  { %v970_v31 = vmul.f32 %v2438_v29, %v968_v30 }
0x14be   :  { %972 = vrot.lane.b32.xlu1 %v970_v31, %s2608_s20 }
0x1530   :  { %v973_v33 = vpop.permute.xlu1 %972 }
0x1531   :  { %v2808_v34 = vadd.f32 %v973_v33, %v965_v32 }
0x1533   :  { %2439 = vtanh.f32 %v2808_v34 }
0x153d   :  { %v2440_v35 = vpop.eup %2439 }
0x153e   :  { %978 = vrot.lane.b32.xlu0 %v2440_v35, %s2608_s20 }
0x15b0   :  { %v979_v47 = vpop.permute.xlu0 %978 }
0x15b1   :  { %v981_v48 = vmul.f32 %v2438_v29, %v979_v47 }
0x15b3   :  { %983 = vrot.lane.b32.xlu1 %v981_v48, %s2609_s3 }
0x1625   :  { %v984_v50 = vpop.permute.xlu1 %983 }
0x1626   :  { %986 = vst.msk [vmem:[#allocation3 + $0xe] sm:$0x3] %vm264_vm3, %v984_v50  ;;  %987 = vst.msk [vmem:[#allocation9] sm:$0x3] %vm264_vm3, %v984_v50 }
0x162d   :  { %v994_v51 = vld [vmem:[#allocation3 + $0x8] sm:$0xff] }
0x162e   :  { %2170 = vmatmul.mubr.msk.f32.vlgmr.msra.gmra.mrb[8].mxu1 %vm161_vm4, %v994_v51 }
0x162f   :  { %2324 = vmatpush3.bf16.msra.mxu1 %v2813_v45  ;;  %2191 = vmatprep.mubr.msk.f32.mxu1 %vm2606_vm0, %v2607_v1 }
0x1630   :  { %2325 = vmatprep.subr.bf16.mxu1 %v2605_v0 }
0x1633   :  { %2327 = vmatpush3.bf16.msra.mxu1 %v2816_v49 }
0x1634   :  { %2334 = vmatprep.subr.bf16.mxu1 %v2605_v0 }
0x1701   :  { %v2171_v54 = vpop.f32.mrb[8].mxu1 }
0x1702   :  { %v1084_v55 = vadd.f32 %v2171_v54, %v1961_v53  ;;  %v1078_v10 = vpop.f32.mrb[9].mxu1 }
0x1703   :  { %v1079_v56 = vadd.f32 %v1961_v53, %v1078_v10 }
0x1704   :  { %1088 = vst [vmem:[#allocation2 + $0x8] sm:$0xff] %v1084_v55 }
0x1705   :  { %1087 = vst [vmem:[#allocation2] sm:$0xff] %v1079_v56 }
0x170c   :  { %v1093_v57 = vld [vmem:[#allocation2] sm:$0x3]  ;;  %v1189_v13 = vld [vmem:[#allocation2 + $0x2] sm:$0x3]  ;;  %v1290_v31 = vld [vmem:[#allocation2 + $0x4] sm:$0x3] }
0x170d   :  { %v1164_v58 = vadd.f32 %v1160_v8, %v1093_v57  ;;  %v1391_v8 = vld [vmem:[#allocation2 + $0x6] sm:$0x3] }
0x170f   :  { %2441 = vtanh.f32 %v1164_v58  ;;  %v1964_v60 = vmul.f32 -1.442695, %v1164_v58 }
0x1711   :  { %2443 = vpow2.f32 %v1964_v60 }
0x1719   :  { %v2442_v59 = vpop.eup %2441 }
0x171a   :  { %1174 = vrot.lane.b32.xlu0 %v2442_v59, %s2608_s20 }
0x171b   :  { %v2444_v61 = vpop.eup %2443 }
0x171c   :  { %v1168_v62 = vadd.f32 1.0, %v2444_v61 }
0x171e   :  { %2445 = vrcp.f32 %v1168_v62 }
0x1728   :  { %v2446_v63 = vpop.eup %2445 }
0x1729   :  { %v1172_v4 = vmul.f32 0.0, %v2446_v63 }
0x178c   :  { %v1175_v2 = vpop.permute.xlu0 %1174 }
0x178d   :  { %v1177_v3 = vmul.f32 %v2446_v63, %v1175_v2 }
0x178f   :  { %1179 = vrot.lane.b32.xlu1 %v1177_v3, %s2608_s20 }
0x1801   :  { %v1180_v5 = vpop.permute.xlu1 %1179 }
0x1802   :  { %v1182_v6 = vadd.f32 %v1180_v5, %v1172_v4 }
0x1804   :  { %2447 = vtanh.f32 %v1182_v6 }
0x180e   :  { %v2448_v7 = vpop.eup %2447 }
0x180f   :  { %1185 = vrot.lane.b32.xlu0 %v2448_v7, %s2608_s20 }
0x1881   :  { %v1186_v9 = vpop.permute.xlu0 %1185 }
0x1882   :  { %v1188_v11 = vmul.f32 %v2446_v63, %v1186_v9 }
0x1884   :  { %1191 = vrot.lane.b32.xlu1 %v1188_v11, %s2609_s3 }
0x18f6   :  { %v1192_v12 = vpop.permute.xlu1 %1191 }
0x18f7   :  { %2192 = vmatmul.mubr.msk.f32.vlgmr.msra.gmra.mrb[10].mxu1 %vm161_vm4, %v1192_v12 }
0x18f8   :  { %2336 = vmatpush3.bf16.msra.mxu1 %v2813_v45  ;;  %2213 = vmatprep.mubr.msk.f32.mxu1 %vm2606_vm0, %v2607_v1 }
0x18f9   :  { %2337 = vmatprep.subr.bf16.mxu1 %v2605_v0 }
0x18fc   :  { %2339 = vmatpush3.bf16.msra.mxu1 %v2816_v49 }
0x18fd   :  { %2346 = vmatprep.subr.bf16.mxu1 %v2605_v0 }
0x19ca   :  { %v1261_v14 = vpop.f32.mrb[10].mxu1 }
0x19cb   :  { %v1265_v15 = vadd.f32 %v1261_v14, %v1189_v13  ;;  %v2193_v16 = vpop.f32.mrb[11].mxu1 }
0x19cd   :  { %2449 = vtanh.f32 %v1265_v15  ;;  %v1966_v18 = vmul.f32 -1.442695, %v1265_v15 }
0x19cf   :  { %2451 = vpow2.f32 %v1966_v18 }
0x19d7   :  { %v2450_v17 = vpop.eup %2449 }
0x19d8   :  { %1275 = vrot.lane.b32.xlu0 %v2450_v17, %s2608_s20 }
0x19d9   :  { %v2452_v19 = vpop.eup %2451 }
0x19da   :  { %v1269_v20 = vadd.f32 1.0, %v2452_v19 }
0x19dc   :  { %2453 = vrcp.f32 %v1269_v20 }
0x19e6   :  { %v2454_v21 = vpop.eup %2453 }
0x19e7   :  { %v1273_v24 = vmul.f32 %v2454_v21, %v1182_v6  ;;  %v1492_v6 = vld [vmem:[#allocation2 + $0x8] sm:$0x3] }
0x1a4a   :  { %v1276_v22 = vpop.permute.xlu0 %1275 }
0x1a4b   :  { %v1278_v23 = vmul.f32 %v2454_v21, %v1276_v22 }
0x1a4d   :  { %1280 = vrot.lane.b32.xlu1 %v1278_v23, %s2608_s20 }
0x1abf   :  { %v1281_v25 = vpop.permute.xlu1 %1280 }
0x1ac0   :  { %v1283_v26 = vadd.f32 %v1281_v25, %v1273_v24 }
0x1ac2   :  { %2455 = vtanh.f32 %v1283_v26 }
0x1acc   :  { %v2456_v27 = vpop.eup %2455 }
0x1acd   :  { %1286 = vrot.lane.b32.xlu0 %v2456_v27, %s2608_s20 }
0x1b3f   :  { %v1287_v28 = vpop.permute.xlu0 %1286 }
0x1b40   :  { %v1289_v29 = vmul.f32 %v2454_v21, %v1287_v28 }
0x1b42   :  { %1292 = vrot.lane.b32.xlu1 %v1289_v29, %s2609_s3 }
0x1bb4   :  { %v1293_v30 = vpop.permute.xlu1 %1292 }
0x1bb5   :  { %2203 = vmatmul.mubr.msk.f32.vlgmr.msra.gmra.mrb[12].mxu0 %vm161_vm4, %v1293_v30 }
0x1bb6   :  { %2342 = vmatpush3.bf16.msra.mxu0 %v2813_v45  ;;  %2224 = vmatprep.mubr.msk.f32.mxu0 %vm2606_vm0, %v2607_v1 }
0x1bb7   :  { %2343 = vmatprep.subr.bf16.mxu0 %v2605_v0 }
0x1bba   :  { %2345 = vmatpush3.bf16.msra.mxu0 %v2816_v49 }
0x1bbb   :  { %2352 = vmatprep.subr.bf16.mxu0 %v2605_v0 }
0x1c88   :  { %v1362_v32 = vpop.f32.mrb[12].mxu0 }
0x1c89   :  { %v1366_v33 = vadd.f32 %v1362_v32, %v1290_v31  ;;  %v2204_v35 = vpop.f32.mrb[13].mxu0 }
0x1c8b   :  { %2457 = vtanh.f32 %v1366_v33  ;;  %v1968_v37 = vmul.f32 -1.442695, %v1366_v33 }
0x1c8d   :  { %2459 = vpow2.f32 %v1968_v37 }
0x1c95   :  { %v2458_v36 = vpop.eup %2457 }
0x1c96   :  { %1376 = vrot.lane.b32.xlu0 %v2458_v36, %s2608_s20 }
0x1c97   :  { %v2460_v38 = vpop.eup %2459 }
0x1c98   :  { %v1370_v39 = vadd.f32 1.0, %v2460_v38 }
0x1c9a   :  { %2461 = vrcp.f32 %v1370_v39 }
0x1ca4   :  { %v2462_v40 = vpop.eup %2461 }
0x1ca5   :  { %v1374_v43 = vmul.f32 %v2462_v40, %v1283_v26  ;;  %v1593_v26 = vld [vmem:[#allocation2 + $0xa] sm:$0x3] }
0x1d08   :  { %v1377_v41 = vpop.permute.xlu0 %1376 }
0x1d09   :  { %v1379_v42 = vmul.f32 %v2462_v40, %v1377_v41  ;;  %v1694_v41 = vld [vmem:[#allocation2 + $0xc] sm:$0x3] }
0x1d0b   :  { %1381 = vrot.lane.b32.xlu1 %v1379_v42, %s2608_s20 }
0x1d7d   :  { %v1382_v44 = vpop.permute.xlu1 %1381 }
0x1d7e   :  { %v1384_v46 = vadd.f32 %v1382_v44, %v1374_v43 }
0x1d80   :  { %2463 = vtanh.f32 %v1384_v46 }
0x1d8a   :  { %v2464_v47 = vpop.eup %2463 }
0x1d8b   :  { %1387 = vrot.lane.b32.xlu0 %v2464_v47, %s2608_s20 }
0x1dfd   :  { %v1388_v48 = vpop.permute.xlu0 %1387 }
0x1dfe   :  { %v1390_v50 = vmul.f32 %v2462_v40, %v1388_v48 }
0x1e00   :  { %1393 = vrot.lane.b32.xlu1 %v1390_v50, %s2609_s3 }
0x1e72   :  { %v1394_v51 = vpop.permute.xlu1 %1393 }
0x1e73   :  { %2214 = vmatmul.mubr.msk.f32.vlgmr.msra.gmra.mrb[12].mxu1 %vm161_vm4, %v1394_v51 }
0x1e74   :  { %2348 = vmatpush3.bf16.msra.mxu1 %v2813_v45  ;;  %2235 = vmatprep.mubr.msk.f32.mxu1 %vm2606_vm0, %v2607_v1 }
0x1e75   :  { %2349 = vmatprep.subr.bf16.mxu1 %v2605_v0 }
0x1e78   :  { %2351 = vmatpush3.bf16.msra.mxu1 %v2816_v49 }
0x1e79   :  { %2358 = vmatprep.subr.bf16.mxu1 %v2605_v0 }
0x1f46   :  { %v1463_v52 = vpop.f32.mrb[12].mxu1 }
0x1f47   :  { %v1467_v53 = vadd.f32 %v1463_v52, %v1391_v8  ;;  %v2215_v54 = vpop.f32.mrb[13].mxu1 }
0x1f49   :  { %2465 = vtanh.f32 %v1467_v53  ;;  %v1970_v10 = vmul.f32 -1.442695, %v1467_v53 }
0x1f4b   :  { %2467 = vpow2.f32 %v1970_v10 }
0x1f53   :  { %v2466_v55 = vpop.eup %2465 }
0x1f54   :  { %1477 = vrot.lane.b32.xlu0 %v2466_v55, %s2608_s20 }
0x1f55   :  { %v2468_v56 = vpop.eup %2467 }
0x1f56   :  { %v1471_v57 = vadd.f32 1.0, %v2468_v56 }
0x1f58   :  { %2469 = vrcp.f32 %v1471_v57 }
0x1f62   :  { %v2470_v58 = vpop.eup %2469 }
0x1f63   :  { %v1475_v61 = vmul.f32 %v2470_v58, %v1384_v46 }
0x1fc6   :  { %v1478_v59 = vpop.permute.xlu0 %1477 }
0x1fc7   :  { %v1480_v60 = vmul.f32 %v2470_v58, %v1478_v59  ;;  %v1795_v59 = vld [vmem:[#allocation2 + $0xe] sm:$0x3] }
0x1fc9   :  { %1482 = vrot.lane.b32.xlu1 %v1480_v60, %s2608_s20 }
0x203b   :  { %v1483_v62 = vpop.permute.xlu1 %1482 }
0x203c   :  { %v1485_v63 = vadd.f32 %v1483_v62, %v1475_v61 }
0x203e   :  { %2471 = vtanh.f32 %v1485_v63 }
0x2048   :  { %v2472_v2 = vpop.eup %2471 }
0x2049   :  { %1488 = vrot.lane.b32.xlu0 %v2472_v2, %s2608_s20 }
0x20bb   :  { %v1489_v3 = vpop.permute.xlu0 %1488 }
0x20bc   :  { %v1491_v4 = vmul.f32 %v2470_v58, %v1489_v3 }
0x20be   :  { %1494 = vrot.lane.b32.xlu1 %v1491_v4, %s2609_s3 }
0x2130   :  { %v1495_v5 = vpop.permute.xlu1 %1494 }
0x2131   :  { %2225 = vmatmul.mubr.msk.f32.vlgmr.msra.gmra.mrb[14].mxu0 %vm161_vm4, %v1495_v5 }
0x2132   :  { %2354 = vmatpush3.bf16.msra.mxu0 %v2813_v45  ;;  %2246 = vmatprep.mubr.msk.f32.mxu0 %vm2606_vm0, %v2607_v1 }
0x2133   :  { %2355 = vmatprep.subr.bf16.mxu0 %v2605_v0 }
0x2136   :  { %2357 = vmatpush3.bf16.msra.mxu0 %v2816_v49 }
0x2204   :  { %v1564_v7 = vpop.f32.mrb[14].mxu0 }
0x2205   :  { %v1568_v9 = vadd.f32 %v1564_v7, %v1492_v6  ;;  %v2226_v11 = vpop.f32.mrb[15].mxu0 }
0x2207   :  { %2473 = vtanh.f32 %v1568_v9  ;;  %v1972_v13 = vmul.f32 -1.442695, %v1568_v9 }
0x2209   :  { %2475 = vpow2.f32 %v1972_v13 }
0x2211   :  { %v2474_v12 = vpop.eup %2473 }
0x2212   :  { %1578 = vrot.lane.b32.xlu0 %v2474_v12, %s2608_s20 }
0x2213   :  { %v2476_v14 = vpop.eup %2475 }
0x2214   :  { %v1572_v15 = vadd.f32 1.0, %v2476_v14 }
0x2216   :  { %2477 = vrcp.f32 %v1572_v15 }
0x2220   :  { %v2478_v16 = vpop.eup %2477 }
0x2221   :  { %v1576_v19 = vmul.f32 %v2478_v16, %v1485_v63 }
0x2284   :  { %v1579_v17 = vpop.permute.xlu0 %1578 }
0x2285   :  { %v1581_v18 = vmul.f32 %v2478_v16, %v1579_v17 }
0x2287   :  { %1583 = vrot.lane.b32.xlu1 %v1581_v18, %s2608_s20 }
0x22f9   :  { %v1584_v20 = vpop.permute.xlu1 %1583 }
0x22fa   :  { %v1586_v21 = vadd.f32 %v1584_v20, %v1576_v19 }
0x22fc   :  { %2479 = vtanh.f32 %v1586_v21 }
0x2306   :  { %v2480_v22 = vpop.eup %2479 }
0x2307   :  { %1589 = vrot.lane.b32.xlu0 %v2480_v22, %s2608_s20 }
0x2379   :  { %v1590_v23 = vpop.permute.xlu0 %1589 }
0x237a   :  { %v1592_v24 = vmul.f32 %v2478_v16, %v1590_v23 }
0x237c   :  { %1595 = vrot.lane.b32.xlu1 %v1592_v24, %s2609_s3 }
0x23ee   :  { %v1596_v25 = vpop.permute.xlu1 %1595 }
0x23ef   :  { %2236 = vmatmul.mubr.msk.f32.vlgmr.msra.gmra.mrb[14].mxu1 %vm161_vm4, %v1596_v25 }
0x23f0   :  { %2360 = vmatpush3.bf16.msra.mxu1 %v2813_v45  ;;  %2257 = vmatprep.mubr.msk.f32.mxu1 %vm2606_vm0, %v2607_v1 }
0x23f1   :  { %2361 = vmatprep.subr.bf16.mxu1 %v2605_v0 }
0x23f4   :  { %2363 = vmatpush3.bf16.msra.mxu1 %v2816_v49 }
0x24c2   :  { %v1665_v27 = vpop.f32.mrb[14].mxu1 }
0x24c3   :  { %v1669_v28 = vadd.f32 %v1665_v27, %v1593_v26  ;;  %v2237_v29 = vpop.f32.mrb[15].mxu1 }
0x24c5   :  { %2481 = vtanh.f32 %v1669_v28  ;;  %v1974_v31 = vmul.f32 -1.442695, %v1669_v28 }
0x24c7   :  { %2483 = vpow2.f32 %v1974_v31 }
0x24cf   :  { %v2482_v30 = vpop.eup %2481 }
0x24d0   :  { %1679 = vrot.lane.b32.xlu0 %v2482_v30, %s2608_s20 }
0x24d1   :  { %v2484_v32 = vpop.eup %2483 }
0x24d2   :  { %v1673_v33 = vadd.f32 1.0, %v2484_v32 }
0x24d4   :  { %2485 = vrcp.f32 %v1673_v33 }
0x24de   :  { %v2486_v45 = vpop.eup %2485 }
0x24df   :  { %v1677_v0 = vmul.f32 %v2486_v45, %v1586_v21 }
0x2542   :  { %v1680_v35 = vpop.permute.xlu0 %1679 }
0x2543   :  { %v1682_v1 = vmul.f32 %v2486_v45, %v1680_v35 }
0x2545   :  { %1684 = vrot.lane.b32.xlu1 %v1682_v1, %s2608_s20 }
0x25b7   :  { %v1685_v49 = vpop.permute.xlu1 %1684 }
0x25b8   :  { %v1687_v36 = vadd.f32 %v1685_v49, %v1677_v0 }
0x25ba   :  { %2487 = vtanh.f32 %v1687_v36 }
0x25c4   :  { %v2488_v37 = vpop.eup %2487 }
0x25c5   :  { %1690 = vrot.lane.b32.xlu0 %v2488_v37, %s2608_s20 }
0x2637   :  { %v1691_v38 = vpop.permute.xlu0 %1690 }
0x2638   :  { %v1693_v39 = vmul.f32 %v2486_v45, %v1691_v38 }
0x263a   :  { %1696 = vrot.lane.b32.xlu1 %v1693_v39, %s2609_s3 }
0x26ac   :  { %v1697_v40 = vpop.permute.xlu1 %1696 }
0x26ad   :  { %2247 = vmatmul.mubr.msk.f32.vlgmr.msra.gmra.mrb[16].mxu0 %vm161_vm4, %v1697_v40 }
0x2780   :  { %v1766_v42 = vpop.f32.mrb[16].mxu0 }
0x2781   :  { %v1770_v43 = vadd.f32 %v1766_v42, %v1694_v41  ;;  %v2248_v44 = vpop.f32.mrb[17].mxu0 }
0x2783   :  { %2489 = vtanh.f32 %v1770_v43  ;;  %v1976_v47 = vmul.f32 -1.442695, %v1770_v43 }
0x2785   :  { %2491 = vpow2.f32 %v1976_v47 }
0x278d   :  { %v2490_v46 = vpop.eup %2489 }
0x278e   :  { %1780 = vrot.lane.b32.xlu0 %v2490_v46, %s2608_s20 }
0x278f   :  { %v2492_v48 = vpop.eup %2491 }
0x2790   :  { %v1774_v50 = vadd.f32 1.0, %v2492_v48 }
0x2792   :  { %2493 = vrcp.f32 %v1774_v50 }
0x279c   :  { %v2494_v51 = vpop.eup %2493 }
0x279d   :  { %v1778_v53 = vmul.f32 %v2494_v51, %v1687_v36 }
0x2800   :  { %v1781_v8 = vpop.permute.xlu0 %1780 }
0x2801   :  { %v1783_v52 = vmul.f32 %v2494_v51, %v1781_v8 }
0x2803   :  { %1785 = vrot.lane.b32.xlu1 %v1783_v52, %s2608_s20 }
0x2875   :  { %v1786_v54 = vpop.permute.xlu1 %1785 }
0x2876   :  { %v1788_v55 = vadd.f32 %v1786_v54, %v1778_v53 }
0x2878   :  { %2495 = vtanh.f32 %v1788_v55 }
0x2882   :  { %v2496_v10 = vpop.eup %2495 }
0x2883   :  { %1791 = vrot.lane.b32.xlu0 %v2496_v10, %s2608_s20 }
0x28f5   :  { %v1792_v56 = vpop.permute.xlu0 %1791 }
0x28f6   :  { %v1794_v57 = vmul.f32 %v2494_v51, %v1792_v56 }
0x28f8   :  { %1797 = vrot.lane.b32.xlu1 %v1794_v57, %s2609_s3 }
0x296a   :  { %v1798_v58 = vpop.permute.xlu1 %1797 }
0x296b   :  { %2258 = vmatmul.mubr.msk.f32.vlgmr.msra.gmra.mrb[16].mxu1 %vm161_vm4, %v1798_v58 }
0x2a3e   :  { %v1867_v60 = vpop.f32.mrb[16].mxu1 }
0x2a3f   :  { %v1871_v61 = vadd.f32 %v1867_v60, %v1795_v59  ;;  %v2259_v62 = vpop.f32.mrb[17].mxu1 }
0x2a41   :  { %2497 = vtanh.f32 %v1871_v61  ;;  %v1978_v2 = vmul.f32 -1.442695, %v1871_v61 }
0x2a43   :  { %2499 = vpow2.f32 %v1978_v2 }
0x2a4b   :  { %v2498_v63 = vpop.eup %2497 }
0x2a4c   :  { %1881 = vrot.lane.b32.xlu0 %v2498_v63, %s2608_s20 }
0x2a4d   :  { %v2500_v3 = vpop.eup %2499 }
0x2a4e   :  { %v1875_v4 = vadd.f32 1.0, %v2500_v3 }
0x2a50   :  { %2501 = vrcp.f32 %v1875_v4 }
0x2a5a   :  { %v2502_v5 = vpop.eup %2501 }
0x2a5b   :  { %v1879_v9 = vmul.f32 %v2502_v5, %v1788_v55 }
0x2abe   :  { %v1882_v6 = vpop.permute.xlu0 %1881 }
0x2abf   :  { %v1884_v7 = vmul.f32 %v2502_v5, %v1882_v6 }
0x2ac1   :  { %1886 = vrot.lane.b32.xlu1 %v1884_v7, %s2608_s20 }
0x2ac5   :  { %989 = vrot.lane.b32.xlu1 %v2808_v34, %s2610_s6 }
0x2b33   :  { %v1887_v11 = vpop.permute.xlu1 %1886 }
0x2b34   :  { %v1889_v12 = vadd.f32 %v1887_v11, %v1879_v9 }
0x2b36   :  { %2503 = vtanh.f32 %v1889_v12  ;;  %1903 = vrot.lane.b32.xlu1 %v1889_v12, %s2610_s6 }
0x2b37   :  { %v990_v13 = vpop.permute.xlu1 %989 }
0x2b38   :  { %992 = vst.msk [vmem:[#allocation10] sm:$0x3] %vm264_vm3, %v990_v13 }
0x2b40   :  { %v2504_v14 = vpop.eup %2503 }
0x2b41   :  { %1892 = vrot.lane.b32.xlu0 %v2504_v14, %s2608_s20 }
0x2ba8   :  { %v1904_v15 = vpop.permute.xlu1 %1903 }
0x2ba9   :  { %1907 = vst.msk [vmem:[#allocation10 + $0x2] sm:$0x3] %vm264_vm3, %v1904_v15 }
0x2baa   :  { %2560 = shalt.err (!%p2557_p6)
}
0x2bab   :  { %s2561_s29 = scalar_lea.hbm %s2948_s8, 64 }
0x2bac   :  { %p2562_p7 = scmp.ne.s32.totalorder %s2948_s8, %s2561_s29  ;;  %p2565_p8 = scmp.lt.u32.totalorder %s2561_s29, %s2948_s8 }
0x2bae   :  { %p2567_p9 = pnand %p2565_p8, %p2562_p7 }
0x2bb0   :  { %2570 = shalt.err (!%p2567_p9)
}
0x2bb1   :  { %s2612_s10 = smov 2   ;;  %s2613_s12 = smov [#allocation9]  }
0x2bb2   :  { %1931 = dma.vmem_to_hbm [thread:$0]  %s1926_s24, 64, %s2948_s8, [#allocation11], %s2608_s20, %s2608_s20, %s2612_s10  }
0x2bb3   :  { %v1893_v34 = vpop.permute.xlu0 %1892  ;;  %s1913_s13 = sshll.u32 %s2613_s12, 4  ;;  %s1914_s13 = int_to_ptr.vmem [resolvable:$true] %s1913_s13 }
0x2bb4   :  { %v1895_v16 = vmul.f32 %v2502_v5, %v1893_v34  ;;  %s2571_s14 = scalar_lea.vmem %s1914_s13, 64  ;;  %p2576_p11 = scmp.lt.s32.totalorder %s1914_s13, %s1914_s13 }
0x2bb5   :  { %p2572_p10 = scmp.ne.s32.totalorder %s1914_s13, %s2571_s14  ;;  %p2577_p12 = scmp.lt.s32.totalorder %s2571_s14, %s2571_s14 }
0x2bb6   :  { %1897 = vrot.lane.b32.xlu0 %v1895_v16, %s2609_s3 }
0x2bb7   :  { %p2578_p13 = por %p2577_p12, %p2576_p11 }
0x2bb9   :  { %p2579_p0 = pnand %p2578_p13, %p2572_p10 }
0x2c28   :  { %v1898_v17 = vpop.permute.xlu0 %1897 }
0x2c29   :  { %1901 = vst.msk [vmem:[#allocation9 + $0x2] sm:$0x3] %vm264_vm3, %v1898_v17 }
0x2c2a   :  { %2582 = shalt.err (!%p2579_p0)
}
0x2c2b   :  { %s2583_s8 = scalar_lea.hbm %s2947_s7, 64 }
0x2c2c   :  { %p2584_p1 = scmp.ne.s32.totalorder %s2947_s7, %s2583_s8  ;;  %p2587_p2 = scmp.lt.u32.totalorder %s2583_s8, %s2947_s7 }
0x2c2e   :  { %p2589_p3 = pnand %p2587_p2, %p2584_p1 }
0x2c30   :  { %2592 = shalt.err (!%p2589_p3)
}
0x2c31   :  { %1919 = dma.vmem_to_hbm [thread:$0]  %s1914_s13, 64, %s2947_s7, [#allocation6], %s2608_s20, %s2608_s20, %s2612_s10  }
0x2c32   :  { %2597 = dma.done.wait [#allocation6], 64  }
0x2c33   :  { %2598 = vsyncadd [#allocation6], 4294967232 }
0x2c34   :  { %2599 = dma.done.wait [#allocation11], 64  }
0x2c35   :  { %2600 = vsyncadd [#allocation11], 4294967232 }
0x2c36   :  { %1938 = vsyncpa [#allocation5], 1 }
0x2c37   :  { %1939 = vsyncpa [#allocation8], 1 }
0x2c38   :  { %1940 = vsyncpa [#allocation6], 1 }
0x2c39   :  { %1941 = vsyncpa [#allocation11], 1 }

</bundles_post_ra>
